<compile_context>
chip_gen: v6e
topology: v6e:2x2x1
jax: 0.10.0
libtpu: 0.0.40
codegen_flags: <defaults>
</compile_context>

<pallas_src>
import numpy as np
import jax
import jax.numpy as jnp
from jax.experimental import pallas as pl
from jax.experimental.pallas import tpu as pltpu


# ----------------------------------------------------------------------------
# Helpers
# ----------------------------------------------------------------------------
def _round_up(x, m):
    return (x + m - 1) // m * m


def _pick_time_chunk(T, tt_max=32):
    """Largest divisor of T that is <= tt_max (timesteps per grid step)."""
    tt = min(T, tt_max)
    while T % tt:
        tt -= 1
    return tt


# ----------------------------------------------------------------------------
# Pallas kernel: recurrent part of one LSTM layer over TT timesteps per grid
# step. Inputs are already lane/sublane padded:
#   gx:   (T, Bp, 4*Hp) f32   precomputed x @ W_ih + b (gate k in cols [k*Hp,))
#   w_hh: (Hp, 4*Hp)    bf16
#   h0/c0:(Bp, Hp)      f32
# Outputs: y (T, Bp, Hp) f32, h_T (Bp, Hp), c_T (Bp, Hp)
# Gate order matches PyTorch: [i, f, g, o].
# ----------------------------------------------------------------------------
def _lstm_recurrent_kernel(gx_ref, w_hh_ref, h0_ref, c0_ref,
                           y_ref, hT_ref, cT_ref, h_scr, c_scr):
    tb = pl.program_id(0)

    @pl.when(tb == 0)
    def _init():
        h_scr[...] = h0_ref[...]
        c_scr[...] = c0_ref[...]

    Hp = h_scr.shape[-1]
    TT = gx_ref.shape[0]
    w_hh = w_hh_ref[...]                     # (Hp, 4*Hp) bf16, loaded once/chunk

    def step(i, carry):
        h = h_scr[...]                       # (Bp, Hp) f32
        c = c_scr[...]
        gates = gx_ref[i] + jnp.dot(h.astype(jnp.bfloat16), w_hh,
                                    preferred_element_type=jnp.float32)
        i_g = jax.nn.sigmoid(gates[:, 0 * Hp:1 * Hp])
        f_g = jax.nn.sigmoid(gates[:, 1 * Hp:2 * Hp])
        g_g = jnp.tanh(gates[:, 2 * Hp:3 * Hp])
        o_g = jax.nn.sigmoid(gates[:, 3 * Hp:4 * Hp])
        c_new = f_g * c + i_g * g_g
        h_new = o_g * jnp.tanh(c_new)
        h_scr[...] = h_new
        c_scr[...] = c_new
        y_ref[i] = h_new                     # lane-dense (Bp, Hp) store
        return carry

    jax.lax.fori_loop(0, TT, step, 0, unroll=True)

    @pl.when(tb == pl.num_programs(0) - 1)
    def _final():
        hT_ref[...] = h_scr[...]
        cT_ref[...] = c_scr[...]


def lstm_layer(x, w_ih, w_hh, b, h0, c0, *, tt_max=32):
    """Run one LSTM layer over a (T, B, Din) sequence.

    The input projection is hoisted into a single batched matmul; the
    sequential recurrence runs in the Pallas kernel above.
    Returns (y (T,B,H), h_T (B,H), c_T (B,H)), all float32.
    """
    T, B, Din = x.shape
    H = w_hh.shape[0]
    Hp = _round_up(H, 128)          # lane-dense hidden width
    Bp = _round_up(B, 8)            # sublane-dense batch
    Gp = 4 * Hp
    TT = _pick_time_chunk(T, tt_max)

    # Gate-blocked, lane-padded weights / bias: gate k occupies columns
    # [k*Hp, k*Hp + H); padded rows/cols are zero so padded lanes of h stay 0.
    w_ih_pad = jnp.pad(w_ih.reshape(Din, 4, H),
                       ((0, 0), (0, 0), (0, Hp - H))).reshape(Din, Gp)
    w_hh_pad = jnp.pad(w_hh.reshape(H, 4, H),
                       ((0, Hp - H), (0, 0), (0, Hp - H))
                       ).reshape(Hp, Gp).astype(jnp.bfloat16)
    b_pad = jnp.pad(b.reshape(4, H), ((0, 0), (0, Hp - H))).reshape(Gp)

    # Hoisted input projection: one large (T*B, Din) x (Din, 4*Hp) matmul.
    gx = x.reshape(T * B, Din).astype(jnp.float32) @ w_ih_pad + b_pad
    gx = gx.reshape(T, B, Gp)
    gx = jnp.pad(gx, ((0, 0), (0, Bp - B), (0, 0)))

    h0p = jnp.pad(h0.astype(jnp.float32), ((0, Bp - B), (0, Hp - H)))
    c0p = jnp.pad(c0.astype(jnp.float32), ((0, Bp - B), (0, Hp - H)))

    out_shapes = (
        jax.ShapeDtypeStruct((T, Bp, Hp), jnp.float32),   # per-step hidden
        jax.ShapeDtypeStruct((Bp, Hp), jnp.float32),      # final h
        jax.ShapeDtypeStruct((Bp, Hp), jnp.float32),      # final c
    )

    grid_spec = pltpu.PrefetchScalarGridSpec(
        num_scalar_prefetch=0,
        grid=(T // TT,),
        in_specs=[
            pl.BlockSpec((TT, Bp, Gp), lambda t: (t, 0, 0)),   # gx chunk
            pl.BlockSpec((Hp, Gp), lambda t: (0, 0)),          # w_hh (resident)
            pl.BlockSpec((Bp, Hp), lambda t: (0, 0)),          # h0
            pl.BlockSpec((Bp, Hp), lambda t: (0, 0)),          # c0
        ],
        out_specs=[
            pl.BlockSpec((TT, Bp, Hp), lambda t: (t, 0, 0)),   # y chunk
            pl.BlockSpec((Bp, Hp), lambda t: (0, 0)),          # h_T
            pl.BlockSpec((Bp, Hp), lambda t: (0, 0)),          # c_T
        ],
        scratch_shapes=[
            pltpu.VMEM((Bp, Hp), jnp.float32),                 # h carry
            pltpu.VMEM((Bp, Hp), jnp.float32),                 # c carry
        ],
    )

    y, hT, cT = pl.pallas_call(
        _lstm_recurrent_kernel,
        out_shape=out_shapes,
        grid_spec=grid_spec,
        compiler_params=pltpu.CompilerParams(
            dimension_semantics=("arbitrary",),    # time chunks are sequential
            vmem_limit_bytes=32 * 1024 * 1024,
        ),
    )(gx, w_hh_pad, h0p, c0p)

    return y[:, :B, :H], hT[:B, :H], cT[:B, :H]


# ----------------------------------------------------------------------------
# Parameter construction (deterministic, PyTorch-style uniform init).
# ----------------------------------------------------------------------------
def init_lstm_params(key, din, h):
    k = 1.0 / np.sqrt(h)
    k0, k1, k2, k3 = jax.random.split(key, 4)
    w_ih = jax.random.uniform(k0, (din, 4 * h), jnp.float32, -k, k)
    w_hh = jax.random.uniform(k1, (h, 4 * h), jnp.float32, -k, k)
    b_ih = jax.random.uniform(k2, (4 * h,), jnp.float32, -k, k)
    b_hh = jax.random.uniform(k3, (4 * h,), jnp.float32, -k, k)
    return {"w_ih": w_ih, "w_hh": w_hh, "b": b_ih + b_hh}


def init_img_lstm_autoencoder_params(key, image_size, hidden_size):
    D = image_size[0] * image_size[1] * image_size[2]
    enc_sizes = [D] + list(hidden_size)                  # encoder LSTMStack
    dec_sizes = list(reversed(enc_sizes))                # [hid[-1],...,hid[0],D]
    params = {"encoder": [], "decoder": []}
    keys = jax.random.split(key, len(hidden_size) + len(dec_sizes))
    ki = 0
    for lin, lout in zip(enc_sizes[:-1], enc_sizes[1:]):
        params["encoder"].append(init_lstm_params(keys[ki], lin, lout)); ki += 1
    # decoder LSTMCellStack: first cell takes the raw input (size D)
    dec_in = [D] + dec_sizes[:-1]
    for lin, lout in zip(dec_in, dec_sizes):
        params["decoder"].append(init_lstm_params(keys[ki], lin, lout)); ki += 1
    return params


# ----------------------------------------------------------------------------
# Full forward pass (ImgLSTMAutoencoder, batch_first=False, decoding_steps=-1).
# ----------------------------------------------------------------------------
def img_lstm_autoencoder_forward(x, params, image_size, decoding_steps=-1):
    # x: (T, B, C, H, W)
    T, B = x.shape[0], x.shape[1]
    D = image_size[0] * image_size[1] * image_size[2]
    seq = x.reshape(T, B, D).astype(jnp.float32)

    # ---- encoder: stacked LSTM over the sequence ----
    layer_in = seq
    h_last = c_last = None
    for p in params["encoder"]:
        Hl = p["w_hh"].shape[0]
        h0 = jnp.zeros((B, Hl), jnp.float32)
        c0 = jnp.zeros((B, Hl), jnp.float32)
        layer_in, h_last, c_last = lstm_layer(
            layer_in, p["w_ih"], p["w_hh"], p["b"], h0, c0)
    representation = (h_last, c_last)   # last encoder layer's final state

    # ---- decoder: LSTMCell stack fed with the time-reversed sequence ----
    steps = T if decoding_steps == -1 else decoding_steps
    dec_in = seq[::-1][:steps]
    for li, p in enumerate(params["decoder"]):
        Hl = p["w_hh"].shape[0]
        if li == 0:
            h0, c0 = representation    # h_0[0], c_0[0] = representation
        else:
            h0 = jnp.zeros((B, Hl), jnp.float32)
            c0 = jnp.zeros((B, Hl), jnp.float32)
        dec_in, _, _ = lstm_layer(dec_in, p["w_ih"], p["w_hh"], p["b"], h0, c0)

    recon = dec_in                                      # (steps, B, D)
    recon_img = recon.reshape((steps, B) + tuple(image_size))
    return recon_img                                    # batch_first=False output


# ----------------------------------------------------------------------------
# Pure-JAX reference (lax.scan LSTM, all-f32) for the correctness check.
# ----------------------------------------------------------------------------
def _ref_lstm_layer(x, w_ih, w_hh, b, h0, c0):
    H = h0.shape[-1]

    def step(carry, xt):
        h, c = carry
        g = xt @ w_ih + h @ w_hh + b
        i = jax.nn.sigmoid(g[:, 0 * H:1 * H])
        f = jax.nn.sigmoid(g[:, 1 * H:2 * H])
        gg = jnp.tanh(g[:, 2 * H:3 * H])
        o = jax.nn.sigmoid(g[:, 3 * H:4 * H])
        c = f * c + i * gg
        h = o * jnp.tanh(c)
        return (h, c), h

    (hT, cT), ys = jax.lax.scan(step, (h0, c0), x)
    return ys, hT, cT


def _ref_forward(x, params, image_size, decoding_steps=-1):
    T, B = x.shape[0], x.shape[1]
    D = image_size[0] * image_size[1] * image_size[2]
    seq = x.reshape(T, B, D).astype(jnp.float32)
    layer_in, h_last, c_last = seq, None, None
    for p in params["encoder"]:
        Hl = p["w_hh"].shape[0]
        layer_in, h_last, c_last = _ref_lstm_layer(
            layer_in, p["w_ih"], p["w_hh"], p["b"],
            jnp.zeros((B, Hl)), jnp.zeros((B, Hl)))
    steps = T if decoding_steps == -1 else decoding_steps
    dec_in = seq[::-1][:steps]
    for li, p in enumerate(params["decoder"]):
        Hl = p["w_hh"].shape[0]
        h0, c0 = ((h_last, c_last) if li == 0
                  else (jnp.zeros((B, Hl)), jnp.zeros((B, Hl))))
        dec_in, _, _ = _ref_lstm_layer(dec_in, p["w_ih"], p["w_hh"], p["b"], h0, c0)
    return dec_in.reshape((steps, B) + tuple(image_size))


if __name__ == "__main__":
    # Frames of (C=4, H=16, W=16) -> D = 1024 features, seq length 8, batch 2.
    image_size = (4, 16, 16)
    hidden_size = [64, 32]
    T, B = 8, 2

    key = jax.random.PRNGKey(0)
    k_param, k_data = jax.random.split(key)
    params = init_img_lstm_autoencoder_params(k_param, image_size, hidden_size)

    x = jax.random.normal(k_data, (T, B) + image_size, dtype=jnp.float32)

    recon = img_lstm_autoencoder_forward(x, params, image_size, decoding_steps=-1)
    recon = jax.block_until_ready(recon)

    assert recon.shape == (T, B) + image_size, recon.shape
    ref = _ref_forward(x, params, image_size, decoding_steps=-1)
    # bf16 is used only for the recurrent h @ W_hh MXU operands (f32 accumulate),
    # so a slightly looser tolerance vs. the all-f32 reference is expected.
    np.testing.assert_allclose(np.asarray(recon), np.asarray(ref),
                               atol=2e-2, rtol=2e-2)

    print("KERNEL_OK")
</pallas_src>

<mosaic_0001>
module attributes {stable_mosaic.version = 11 : i64} {
  func.func @_lstm_recurrent_kernel(%arg0: i32, %arg1: memref<8x8x512xf32, #tpu.memory_space<vmem>>, %arg2: memref<128x512xbf16, #tpu.memory_space<vmem>>, %arg3: memref<8x128xf32, #tpu.memory_space<vmem>>, %arg4: memref<8x128xf32, #tpu.memory_space<vmem>>, %arg5: memref<8x8x128xf32, #tpu.memory_space<vmem>>, %arg6: memref<8x128xf32, #tpu.memory_space<vmem>>, %arg7: memref<8x128xf32, #tpu.memory_space<vmem>>, %arg8: memref<8x128xf32, #tpu.memory_space<vmem>>, %arg9: memref<8x128xf32, #tpu.memory_space<vmem>>) attributes {dimension_semantics = [#tpu.dimension_semantics<arbitrary>], iteration_bounds = array<i64: 1>, scalar_prefetch = 0 : i64, scratch_operands = 2 : i64, tpu.core_type = #tpu.core_type<tc>, window_params = [{transform_indices = @transform_0, window_bounds = array<i64: 8, 8, 512>}, {pipeline_mode = #tpu.pipeline_mode<synchronous>, transform_indices = @transform_1, window_bounds = array<i64: 128, 512>}, {pipeline_mode = #tpu.pipeline_mode<synchronous>, transform_indices = @transform_2, window_bounds = array<i64: 8, 128>}, {pipeline_mode = #tpu.pipeline_mode<synchronous>, transform_indices = @transform_3, window_bounds = array<i64: 8, 128>}, {transform_indices = @transform_4, window_bounds = array<i64: 8, 8, 128>}, {pipeline_mode = #tpu.pipeline_mode<synchronous>, transform_indices = @transform_5, window_bounds = array<i64: 8, 128>}, {pipeline_mode = #tpu.pipeline_mode<synchronous>, transform_indices = @transform_6, window_bounds = array<i64: 8, 128>}]} {
    %c0_i32 = arith.constant 0 : i32
    %0 = arith.cmpi eq, %arg0, %c0_i32 : i32
    %1 = arith.extui %0 : i1 to i32
    %c0_i32_0 = arith.constant 0 : i32
    %2 = arith.cmpi ne, %1, %c0_i32_0 : i32
    scf.if %2 {
      %c0_132 = arith.constant 0 : index
      %c0_133 = arith.constant 0 : index
      %319 = vector.load %arg3[%c0_132, %c0_133] : memref<8x128xf32, #tpu.memory_space<vmem>>, vector<8x128xf32>
      %c0_134 = arith.constant 0 : index
      %c0_135 = arith.constant 0 : index
      %320 = vector.load %arg8[%c0_134, %c0_135] : memref<8x128xf32, #tpu.memory_space<vmem>>, vector<8x128xf32>
      tpu.vector_store %arg8[%c0_134, %c0_135], %319 {strides = array<i32>} : memref<8x128xf32, #tpu.memory_space<vmem>>, vector<8x128xf32>,
      %c0_136 = arith.constant 0 : index
      %c0_137 = arith.constant 0 : index
      %321 = vector.load %arg4[%c0_136, %c0_137] : memref<8x128xf32, #tpu.memory_space<vmem>>, vector<8x128xf32>
      %c0_138 = arith.constant 0 : index
      %c0_139 = arith.constant 0 : index
      %322 = vector.load %arg9[%c0_138, %c0_139] : memref<8x128xf32, #tpu.memory_space<vmem>>, vector<8x128xf32>
      tpu.vector_store %arg9[%c0_138, %c0_139], %321 {strides = array<i32>} : memref<8x128xf32, #tpu.memory_space<vmem>>, vector<8x128xf32>,
    } else {
    }
    %c0 = arith.constant 0 : index
    %c0_1 = arith.constant 0 : index
    %3 = vector.load %arg2[%c0, %c0_1] : memref<128x512xbf16, #tpu.memory_space<vmem>>, vector<128x512xbf16>
    %c0_i32_2 = arith.constant 0 : i32
    %c0_3 = arith.constant 0 : index
    %c0_4 = arith.constant 0 : index
    %4 = vector.load %arg8[%c0_3, %c0_4] : memref<8x128xf32, #tpu.memory_space<vmem>>, vector<8x128xf32>
    %c0_5 = arith.constant 0 : index
    %c0_6 = arith.constant 0 : index
    %5 = vector.load %arg9[%c0_5, %c0_6] : memref<8x128xf32, #tpu.memory_space<vmem>>, vector<8x128xf32>
    %6 = arith.index_cast %c0_i32_2 : i32 to index
    %c0_7 = arith.constant 0 : index
    %c0_8 = arith.constant 0 : index
    %7 = vector.load %arg1[%6, %c0_7, %c0_8] : memref<8x8x512xf32, #tpu.memory_space<vmem>>, vector<1x8x512xf32>
    %8 = vector.shape_cast %7 : vector<1x8x512xf32> to vector<8x512xf32>
    %9 = arith.truncf %4 : vector<8x128xf32> to vector<8x128xbf16>
    %cst = arith.constant dense<0.000000e+00> : vector<8x512xf32>
    %10 = tpu.matmul %9, %3, %cst {dimension_numbers = #tpu.dot_dimension_numbers<[1], [0], [0], [1], [0, 0, 1, 1], [], []>} : vector<8x128xbf16>, vector<128x512xbf16>, vector<8x512xf32> -> vector<8x512xf32>
    %11 = arith.addf %8, %10 : vector<8x512xf32>
    %12 = vector.extract_strided_slice %11 {offsets = [0, 0], sizes = [8, 128], strides = [1, 1]} : vector<8x512xf32> to vector<8x128xf32>
    %13 = arith.negf %12 : vector<8x128xf32>
    %14 = math.exp %13 : vector<8x128xf32>
    %cst_9 = arith.constant 1.000000e+00 : f32
    %15 = vector.broadcast %cst_9 : f32 to vector<8x128xf32>
    %16 = arith.addf %15, %14 : vector<8x128xf32>
    %17 = arith.divf %15, %16 : vector<8x128xf32>
    %18 = vector.extract_strided_slice %11 {offsets = [0, 128], sizes = [8, 128], strides = [1, 1]} : vector<8x512xf32> to vector<8x128xf32>
    %19 = arith.negf %18 : vector<8x128xf32>
    %20 = math.exp %19 : vector<8x128xf32>
    %cst_10 = arith.constant 1.000000e+00 : f32
    %21 = vector.broadcast %cst_10 : f32 to vector<8x128xf32>
    %22 = arith.addf %21, %20 : vector<8x128xf32>
    %23 = arith.divf %21, %22 : vector<8x128xf32>
    %24 = vector.extract_strided_slice %11 {offsets = [0, 256], sizes = [8, 128], strides = [1, 1]} : vector<8x512xf32> to vector<8x128xf32>
    %25 = math.tanh %24 : vector<8x128xf32>
    %26 = vector.extract_strided_slice %11 {offsets = [0, 384], sizes = [8, 128], strides = [1, 1]} : vector<8x512xf32> to vector<8x128xf32>
    %27 = arith.negf %26 : vector<8x128xf32>
    %28 = math.exp %27 : vector<8x128xf32>
    %cst_11 = arith.constant 1.000000e+00 : f32
    %29 = vector.broadcast %cst_11 : f32 to vector<8x128xf32>
    %30 = arith.addf %29, %28 : vector<8x128xf32>
    %31 = arith.divf %29, %30 : vector<8x128xf32>
    %32 = arith.mulf %23, %5 : vector<8x128xf32>
    %33 = arith.mulf %17, %25 : vector<8x128xf32>
    %34 = arith.addf %32, %33 : vector<8x128xf32>
    %35 = math.tanh %34 : vector<8x128xf32>
    %36 = arith.mulf %31, %35 : vector<8x128xf32>
    %c0_12 = arith.constant 0 : index
    %c0_13 = arith.constant 0 : index
    %37 = vector.load %arg8[%c0_12, %c0_13] : memref<8x128xf32, #tpu.memory_space<vmem>>, vector<8x128xf32>
    tpu.vector_store %arg8[%c0_12, %c0_13], %36 {strides = array<i32>} : memref<8x128xf32, #tpu.memory_space<vmem>>, vector<8x128xf32>,
    %c0_14 = arith.constant 0 : index
    %c0_15 = arith.constant 0 : index
    %38 = vector.load %arg9[%c0_14, %c0_15] : memref<8x128xf32, #tpu.memory_space<vmem>>, vector<8x128xf32>
    tpu.vector_store %arg9[%c0_14, %c0_15], %34 {strides = array<i32>} : memref<8x128xf32, #tpu.memory_space<vmem>>, vector<8x128xf32>,
    %39 = arith.index_cast %c0_i32_2 : i32 to index
    %c0_16 = arith.constant 0 : index
    %c0_17 = arith.constant 0 : index
    %40 = vector.load %arg5[%39, %c0_16, %c0_17] : memref<8x8x128xf32, #tpu.memory_space<vmem>>, vector<1x8x128xf32>
    %41 = vector.shape_cast %40 : vector<1x8x128xf32> to vector<8x128xf32>
    %42 = vector.shape_cast %36 : vector<8x128xf32> to vector<1x8x128xf32>
    tpu.vector_store %arg5[%39, %c0_16, %c0_17], %42 {strides = array<i32>} : memref<8x8x128xf32, #tpu.memory_space<vmem>>, vector<1x8x128xf32>,
    %c1_i32 = arith.constant 1 : i32
    %c0_18 = arith.constant 0 : index
    %c0_19 = arith.constant 0 : index
    %43 = vector.load %arg8[%c0_18, %c0_19] : memref<8x128xf32, #tpu.memory_space<vmem>>, vector<8x128xf32>
    %c0_20 = arith.constant 0 : index
    %c0_21 = arith.constant 0 : index
    %44 = vector.load %arg9[%c0_20, %c0_21] : memref<8x128xf32, #tpu.memory_space<vmem>>, vector<8x128xf32>
    %45 = arith.index_cast %c1_i32 : i32 to index
    %c0_22 = arith.constant 0 : index
    %c0_23 = arith.constant 0 : index
    %46 = vector.load %arg1[%45, %c0_22, %c0_23] : memref<8x8x512xf32, #tpu.memory_space<vmem>>, vector<1x8x512xf32>
    %47 = vector.shape_cast %46 : vector<1x8x512xf32> to vector<8x512xf32>
    %48 = arith.truncf %43 : vector<8x128xf32> to vector<8x128xbf16>
    %cst_24 = arith.constant dense<0.000000e+00> : vector<8x512xf32>
    %49 = tpu.matmul %48, %3, %cst_24 {dimension_numbers = #tpu.dot_dimension_numbers<[1], [0], [0], [1], [0, 0, 1, 1], [], []>} : vector<8x128xbf16>, vector<128x512xbf16>, vector<8x512xf32> -> vector<8x512xf32>
    %50 = arith.addf %47, %49 : vector<8x512xf32>
    %51 = vector.extract_strided_slice %50 {offsets = [0, 0], sizes = [8, 128], strides = [1, 1]} : vector<8x512xf32> to vector<8x128xf32>
    %52 = arith.negf %51 : vector<8x128xf32>
    %53 = math.exp %52 : vector<8x128xf32>
    %cst_25 = arith.constant 1.000000e+00 : f32
    %54 = vector.broadcast %cst_25 : f32 to vector<8x128xf32>
    %55 = arith.addf %54, %53 : vector<8x128xf32>
    %56 = arith.divf %54, %55 : vector<8x128xf32>
    %57 = vector.extract_strided_slice %50 {offsets = [0, 128], sizes = [8, 128], strides = [1, 1]} : vector<8x512xf32> to vector<8x128xf32>
    %58 = arith.negf %57 : vector<8x128xf32>
    %59 = math.exp %58 : vector<8x128xf32>
    %cst_26 = arith.constant 1.000000e+00 : f32
    %60 = vector.broadcast %cst_26 : f32 to vector<8x128xf32>
    %61 = arith.addf %60, %59 : vector<8x128xf32>
    %62 = arith.divf %60, %61 : vector<8x128xf32>
    %63 = vector.extract_strided_slice %50 {offsets = [0, 256], sizes = [8, 128], strides = [1, 1]} : vector<8x512xf32> to vector<8x128xf32>
    %64 = math.tanh %63 : vector<8x128xf32>
    %65 = vector.extract_strided_slice %50 {offsets = [0, 384], sizes = [8, 128], strides = [1, 1]} : vector<8x512xf32> to vector<8x128xf32>
    %66 = arith.negf %65 : vector<8x128xf32>
    %67 = math.exp %66 : vector<8x128xf32>
    %cst_27 = arith.constant 1.000000e+00 : f32
    %68 = vector.broadcast %cst_27 : f32 to vector<8x128xf32>
    %69 = arith.addf %68, %67 : vector<8x128xf32>
    %70 = arith.divf %68, %69 : vector<8x128xf32>
    %71 = arith.mulf %62, %44 : vector<8x128xf32>
    %72 = arith.mulf %56, %64 : vector<8x128xf32>
    %73 = arith.addf %71, %72 : vector<8x128xf32>
    %74 = math.tanh %73 : vector<8x128xf32>
    %75 = arith.mulf %70, %74 : vector<8x128xf32>
    %c0_28 = arith.constant 0 : index
    %c0_29 = arith.constant 0 : index
    %76 = vector.load %arg8[%c0_28, %c0_29] : memref<8x128xf32, #tpu.memory_space<vmem>>, vector<8x128xf32>
    tpu.vector_store %arg8[%c0_28, %c0_29], %75 {strides = array<i32>} : memref<8x128xf32, #tpu.memory_space<vmem>>, vector<8x128xf32>,
    %c0_30 = arith.constant 0 : index
    %c0_31 = arith.constant 0 : index
    %77 = vector.load %arg9[%c0_30, %c0_31] : memref<8x128xf32, #tpu.memory_space<vmem>>, vector<8x128xf32>
    tpu.vector_store %arg9[%c0_30, %c0_31], %73 {strides = array<i32>} : memref<8x128xf32, #tpu.memory_space<vmem>>, vector<8x128xf32>,
    %78 = arith.index_cast %c1_i32 : i32 to index
    %c0_32 = arith.constant 0 : index
    %c0_33 = arith.constant 0 : index
    %79 = vector.load %arg5[%78, %c0_32, %c0_33] : memref<8x8x128xf32, #tpu.memory_space<vmem>>, vector<1x8x128xf32>
    %80 = vector.shape_cast %79 : vector<1x8x128xf32> to vector<8x128xf32>
    %81 = vector.shape_cast %75 : vector<8x128xf32> to vector<1x8x128xf32>
    tpu.vector_store %arg5[%78, %c0_32, %c0_33], %81 {strides = array<i32>} : memref<8x8x128xf32, #tpu.memory_space<vmem>>, vector<1x8x128xf32>,
    %c2_i32 = arith.constant 2 : i32
    %c0_34 = arith.constant 0 : index
    %c0_35 = arith.constant 0 : index
    %82 = vector.load %arg8[%c0_34, %c0_35] : memref<8x128xf32, #tpu.memory_space<vmem>>, vector<8x128xf32>
    %c0_36 = arith.constant 0 : index
    %c0_37 = arith.constant 0 : index
    %83 = vector.load %arg9[%c0_36, %c0_37] : memref<8x128xf32, #tpu.memory_space<vmem>>, vector<8x128xf32>
    %84 = arith.index_cast %c2_i32 : i32 to index
    %c0_38 = arith.constant 0 : index
    %c0_39 = arith.constant 0 : index
    %85 = vector.load %arg1[%84, %c0_38, %c0_39] : memref<8x8x512xf32, #tpu.memory_space<vmem>>, vector<1x8x512xf32>
    %86 = vector.shape_cast %85 : vector<1x8x512xf32> to vector<8x512xf32>
    %87 = arith.truncf %82 : vector<8x128xf32> to vector<8x128xbf16>
    %cst_40 = arith.constant dense<0.000000e+00> : vector<8x512xf32>
    %88 = tpu.matmul %87, %3, %cst_40 {dimension_numbers = #tpu.dot_dimension_numbers<[1], [0], [0], [1], [0, 0, 1, 1], [], []>} : vector<8x128xbf16>, vector<128x512xbf16>, vector<8x512xf32> -> vector<8x512xf32>
    %89 = arith.addf %86, %88 : vector<8x512xf32>
    %90 = vector.extract_strided_slice %89 {offsets = [0, 0], sizes = [8, 128], strides = [1, 1]} : vector<8x512xf32> to vector<8x128xf32>
    %91 = arith.negf %90 : vector<8x128xf32>
    %92 = math.exp %91 : vector<8x128xf32>
    %cst_41 = arith.constant 1.000000e+00 : f32
    %93 = vector.broadcast %cst_41 : f32 to vector<8x128xf32>
    %94 = arith.addf %93, %92 : vector<8x128xf32>
    %95 = arith.divf %93, %94 : vector<8x128xf32>
    %96 = vector.extract_strided_slice %89 {offsets = [0, 128], sizes = [8, 128], strides = [1, 1]} : vector<8x512xf32> to vector<8x128xf32>
    %97 = arith.negf %96 : vector<8x128xf32>
    %98 = math.exp %97 : vector<8x128xf32>
    %cst_42 = arith.constant 1.000000e+00 : f32
    %99 = vector.broadcast %cst_42 : f32 to vector<8x128xf32>
    %100 = arith.addf %99, %98 : vector<8x128xf32>
    %101 = arith.divf %99, %100 : vector<8x128xf32>
    %102 = vector.extract_strided_slice %89 {offsets = [0, 256], sizes = [8, 128], strides = [1, 1]} : vector<8x512xf32> to vector<8x128xf32>
    %103 = math.tanh %102 : vector<8x128xf32>
    %104 = vector.extract_strided_slice %89 {offsets = [0, 384], sizes = [8, 128], strides = [1, 1]} : vector<8x512xf32> to vector<8x128xf32>
    %105 = arith.negf %104 : vector<8x128xf32>
    %106 = math.exp %105 : vector<8x128xf32>
    %cst_43 = arith.constant 1.000000e+00 : f32
    %107 = vector.broadcast %cst_43 : f32 to vector<8x128xf32>
    %108 = arith.addf %107, %106 : vector<8x128xf32>
    %109 = arith.divf %107, %108 : vector<8x128xf32>
    %110 = arith.mulf %101, %83 : vector<8x128xf32>
    %111 = arith.mulf %95, %103 : vector<8x128xf32>
    %112 = arith.addf %110, %111 : vector<8x128xf32>
    %113 = math.tanh %112 : vector<8x128xf32>
    %114 = arith.mulf %109, %113 : vector<8x128xf32>
    %c0_44 = arith.constant 0 : index
    %c0_45 = arith.constant 0 : index
    %115 = vector.load %arg8[%c0_44, %c0_45] : memref<8x128xf32, #tpu.memory_space<vmem>>, vector<8x128xf32>
    tpu.vector_store %arg8[%c0_44, %c0_45], %114 {strides = array<i32>} : memref<8x128xf32, #tpu.memory_space<vmem>>, vector<8x128xf32>,
    %c0_46 = arith.constant 0 : index
    %c0_47 = arith.constant 0 : index
    %116 = vector.load %arg9[%c0_46, %c0_47] : memref<8x128xf32, #tpu.memory_space<vmem>>, vector<8x128xf32>
    tpu.vector_store %arg9[%c0_46, %c0_47], %112 {strides = array<i32>} : memref<8x128xf32, #tpu.memory_space<vmem>>, vector<8x128xf32>,
    %117 = arith.index_cast %c2_i32 : i32 to index
    %c0_48 = arith.constant 0 : index
    %c0_49 = arith.constant 0 : index
    %118 = vector.load %arg5[%117, %c0_48, %c0_49] : memref<8x8x128xf32, #tpu.memory_space<vmem>>, vector<1x8x128xf32>
    %119 = vector.shape_cast %118 : vector<1x8x128xf32> to vector<8x128xf32>
    %120 = vector.shape_cast %114 : vector<8x128xf32> to vector<1x8x128xf32>
    tpu.vector_store %arg5[%117, %c0_48, %c0_49], %120 {strides = array<i32>} : memref<8x8x128xf32, #tpu.memory_space<vmem>>, vector<1x8x128xf32>,
    %c3_i32 = arith.constant 3 : i32
    %c0_50 = arith.constant 0 : index
    %c0_51 = arith.constant 0 : index
    %121 = vector.load %arg8[%c0_50, %c0_51] : memref<8x128xf32, #tpu.memory_space<vmem>>, vector<8x128xf32>
    %c0_52 = arith.constant 0 : index
    %c0_53 = arith.constant 0 : index
    %122 = vector.load %arg9[%c0_52, %c0_53] : memref<8x128xf32, #tpu.memory_space<vmem>>, vector<8x128xf32>
    %123 = arith.index_cast %c3_i32 : i32 to index
    %c0_54 = arith.constant 0 : index
    %c0_55 = arith.constant 0 : index
    %124 = vector.load %arg1[%123, %c0_54, %c0_55] : memref<8x8x512xf32, #tpu.memory_space<vmem>>, vector<1x8x512xf32>
    %125 = vector.shape_cast %124 : vector<1x8x512xf32> to vector<8x512xf32>
    %126 = arith.truncf %121 : vector<8x128xf32> to vector<8x128xbf16>
    %cst_56 = arith.constant dense<0.000000e+00> : vector<8x512xf32>
    %127 = tpu.matmul %126, %3, %cst_56 {dimension_numbers = #tpu.dot_dimension_numbers<[1], [0], [0], [1], [0, 0, 1, 1], [], []>} : vector<8x128xbf16>, vector<128x512xbf16>, vector<8x512xf32> -> vector<8x512xf32>
    %128 = arith.addf %125, %127 : vector<8x512xf32>
    %129 = vector.extract_strided_slice %128 {offsets = [0, 0], sizes = [8, 128], strides = [1, 1]} : vector<8x512xf32> to vector<8x128xf32>
    %130 = arith.negf %129 : vector<8x128xf32>
    %131 = math.exp %130 : vector<8x128xf32>
    %cst_57 = arith.constant 1.000000e+00 : f32
    %132 = vector.broadcast %cst_57 : f32 to vector<8x128xf32>
    %133 = arith.addf %132, %131 : vector<8x128xf32>
    %134 = arith.divf %132, %133 : vector<8x128xf32>
    %135 = vector.extract_strided_slice %128 {offsets = [0, 128], sizes = [8, 128], strides = [1, 1]} : vector<8x512xf32> to vector<8x128xf32>
    %136 = arith.negf %135 : vector<8x128xf32>
    %137 = math.exp %136 : vector<8x128xf32>
    %cst_58 = arith.constant 1.000000e+00 : f32
    %138 = vector.broadcast %cst_58 : f32 to vector<8x128xf32>
    %139 = arith.addf %138, %137 : vector<8x128xf32>
    %140 = arith.divf %138, %139 : vector<8x128xf32>
    %141 = vector.extract_strided_slice %128 {offsets = [0, 256], sizes = [8, 128], strides = [1, 1]} : vector<8x512xf32> to vector<8x128xf32>
    %142 = math.tanh %141 : vector<8x128xf32>
    %143 = vector.extract_strided_slice %128 {offsets = [0, 384], sizes = [8, 128], strides = [1, 1]} : vector<8x512xf32> to vector<8x128xf32>
    %144 = arith.negf %143 : vector<8x128xf32>
    %145 = math.exp %144 : vector<8x128xf32>
    %cst_59 = arith.constant 1.000000e+00 : f32
    %146 = vector.broadcast %cst_59 : f32 to vector<8x128xf32>
    %147 = arith.addf %146, %145 : vector<8x128xf32>
    %148 = arith.divf %146, %147 : vector<8x128xf32>
    %149 = arith.mulf %140, %122 : vector<8x128xf32>
    %150 = arith.mulf %134, %142 : vector<8x128xf32>
    %151 = arith.addf %149, %150 : vector<8x128xf32>
    %152 = math.tanh %151 : vector<8x128xf32>
    %153 = arith.mulf %148, %152 : vector<8x128xf32>
    %c0_60 = arith.constant 0 : index
    %c0_61 = arith.constant 0 : index
    %154 = vector.load %arg8[%c0_60, %c0_61] : memref<8x128xf32, #tpu.memory_space<vmem>>, vector<8x128xf32>
    tpu.vector_store %arg8[%c0_60, %c0_61], %153 {strides = array<i32>} : memref<8x128xf32, #tpu.memory_space<vmem>>, vector<8x128xf32>,
    %c0_62 = arith.constant 0 : index
    %c0_63 = arith.constant 0 : index
    %155 = vector.load %arg9[%c0_62, %c0_63] : memref<8x128xf32, #tpu.memory_space<vmem>>, vector<8x128xf32>
    tpu.vector_store %arg9[%c0_62, %c0_63], %151 {strides = array<i32>} : memref<8x128xf32, #tpu.memory_space<vmem>>, vector<8x128xf32>,
    %156 = arith.index_cast %c3_i32 : i32 to index
    %c0_64 = arith.constant 0 : index
    %c0_65 = arith.constant 0 : index
    %157 = vector.load %arg5[%156, %c0_64, %c0_65] : memref<8x8x128xf32, #tpu.memory_space<vmem>>, vector<1x8x128xf32>
    %158 = vector.shape_cast %157 : vector<1x8x128xf32> to vector<8x128xf32>
    %159 = vector.shape_cast %153 : vector<8x128xf32> to vector<1x8x128xf32>
    tpu.vector_store %arg5[%156, %c0_64, %c0_65], %159 {strides = array<i32>} : memref<8x8x128xf32, #tpu.memory_space<vmem>>, vector<1x8x128xf32>,
    %c4_i32 = arith.constant 4 : i32
    %c0_66 = arith.constant 0 : index
    %c0_67 = arith.constant 0 : index
    %160 = vector.load %arg8[%c0_66, %c0_67] : memref<8x128xf32, #tpu.memory_space<vmem>>, vector<8x128xf32>
    %c0_68 = arith.constant 0 : index
    %c0_69 = arith.constant 0 : index
    %161 = vector.load %arg9[%c0_68, %c0_69] : memref<8x128xf32, #tpu.memory_space<vmem>>, vector<8x128xf32>
    %162 = arith.index_cast %c4_i32 : i32 to index
    %c0_70 = arith.constant 0 : index
    %c0_71 = arith.constant 0 : index
    %163 = vector.load %arg1[%162, %c0_70, %c0_71] : memref<8x8x512xf32, #tpu.memory_space<vmem>>, vector<1x8x512xf32>
    %164 = vector.shape_cast %163 : vector<1x8x512xf32> to vector<8x512xf32>
    %165 = arith.truncf %160 : vector<8x128xf32> to vector<8x128xbf16>
    %cst_72 = arith.constant dense<0.000000e+00> : vector<8x512xf32>
    %166 = tpu.matmul %165, %3, %cst_72 {dimension_numbers = #tpu.dot_dimension_numbers<[1], [0], [0], [1], [0, 0, 1, 1], [], []>} : vector<8x128xbf16>, vector<128x512xbf16>, vector<8x512xf32> -> vector<8x512xf32>
    %167 = arith.addf %164, %166 : vector<8x512xf32>
    %168 = vector.extract_strided_slice %167 {offsets = [0, 0], sizes = [8, 128], strides = [1, 1]} : vector<8x512xf32> to vector<8x128xf32>
    %169 = arith.negf %168 : vector<8x128xf32>
    %170 = math.exp %169 : vector<8x128xf32>
    %cst_73 = arith.constant 1.000000e+00 : f32
    %171 = vector.broadcast %cst_73 : f32 to vector<8x128xf32>
    %172 = arith.addf %171, %170 : vector<8x128xf32>
    %173 = arith.divf %171, %172 : vector<8x128xf32>
    %174 = vector.extract_strided_slice %167 {offsets = [0, 128], sizes = [8, 128], strides = [1, 1]} : vector<8x512xf32> to vector<8x128xf32>
    %175 = arith.negf %174 : vector<8x128xf32>
    %176 = math.exp %175 : vector<8x128xf32>
    %cst_74 = arith.constant 1.000000e+00 : f32
    %177 = vector.broadcast %cst_74 : f32 to vector<8x128xf32>
    %178 = arith.addf %177, %176 : vector<8x128xf32>
    %179 = arith.divf %177, %178 : vector<8x128xf32>
    %180 = vector.extract_strided_slice %167 {offsets = [0, 256], sizes = [8, 128], strides = [1, 1]} : vector<8x512xf32> to vector<8x128xf32>
    %181 = math.tanh %180 : vector<8x128xf32>
    %182 = vector.extract_strided_slice %167 {offsets = [0, 384], sizes = [8, 128], strides = [1, 1]} : vector<8x512xf32> to vector<8x128xf32>
    %183 = arith.negf %182 : vector<8x128xf32>
    %184 = math.exp %183 : vector<8x128xf32>
    %cst_75 = arith.constant 1.000000e+00 : f32
    %185 = vector.broadcast %cst_75 : f32 to vector<8x128xf32>
    %186 = arith.addf %185, %184 : vector<8x128xf32>
    %187 = arith.divf %185, %186 : vector<8x128xf32>
    %188 = arith.mulf %179, %161 : vector<8x128xf32>
    %189 = arith.mulf %173, %181 : vector<8x128xf32>
    %190 = arith.addf %188, %189 : vector<8x128xf32>
    %191 = math.tanh %190 : vector<8x128xf32>
    %192 = arith.mulf %187, %191 : vector<8x128xf32>
    %c0_76 = arith.constant 0 : index
    %c0_77 = arith.constant 0 : index
    %193 = vector.load %arg8[%c0_76, %c0_77] : memref<8x128xf32, #tpu.memory_space<vmem>>, vector<8x128xf32>
    tpu.vector_store %arg8[%c0_76, %c0_77], %192 {strides = array<i32>} : memref<8x128xf32, #tpu.memory_space<vmem>>, vector<8x128xf32>,
    %c0_78 = arith.constant 0 : index
    %c0_79 = arith.constant 0 : index
    %194 = vector.load %arg9[%c0_78, %c0_79] : memref<8x128xf32, #tpu.memory_space<vmem>>, vector<8x128xf32>
    tpu.vector_store %arg9[%c0_78, %c0_79], %190 {strides = array<i32>} : memref<8x128xf32, #tpu.memory_space<vmem>>, vector<8x128xf32>,
    %195 = arith.index_cast %c4_i32 : i32 to index
    %c0_80 = arith.constant 0 : index
    %c0_81 = arith.constant 0 : index
    %196 = vector.load %arg5[%195, %c0_80, %c0_81] : memref<8x8x128xf32, #tpu.memory_space<vmem>>, vector<1x8x128xf32>
    %197 = vector.shape_cast %196 : vector<1x8x128xf32> to vector<8x128xf32>
    %198 = vector.shape_cast %192 : vector<8x128xf32> to vector<1x8x128xf32>
    tpu.vector_store %arg5[%195, %c0_80, %c0_81], %198 {strides = array<i32>} : memref<8x8x128xf32, #tpu.memory_space<vmem>>, vector<1x8x128xf32>,
    %c5_i32 = arith.constant 5 : i32
    %c0_82 = arith.constant 0 : index
    %c0_83 = arith.constant 0 : index
    %199 = vector.load %arg8[%c0_82, %c0_83] : memref<8x128xf32, #tpu.memory_space<vmem>>, vector<8x128xf32>
    %c0_84 = arith.constant 0 : index
    %c0_85 = arith.constant 0 : index
    %200 = vector.load %arg9[%c0_84, %c0_85] : memref<8x128xf32, #tpu.memory_space<vmem>>, vector<8x128xf32>
    %201 = arith.index_cast %c5_i32 : i32 to index
    %c0_86 = arith.constant 0 : index
    %c0_87 = arith.constant 0 : index
    %202 = vector.load %arg1[%201, %c0_86, %c0_87] : memref<8x8x512xf32, #tpu.memory_space<vmem>>, vector<1x8x512xf32>
    %203 = vector.shape_cast %202 : vector<1x8x512xf32> to vector<8x512xf32>
    %204 = arith.truncf %199 : vector<8x128xf32> to vector<8x128xbf16>
    %cst_88 = arith.constant dense<0.000000e+00> : vector<8x512xf32>
    %205 = tpu.matmul %204, %3, %cst_88 {dimension_numbers = #tpu.dot_dimension_numbers<[1], [0], [0], [1], [0, 0, 1, 1], [], []>} : vector<8x128xbf16>, vector<128x512xbf16>, vector<8x512xf32> -> vector<8x512xf32>
    %206 = arith.addf %203, %205 : vector<8x512xf32>
    %207 = vector.extract_strided_slice %206 {offsets = [0, 0], sizes = [8, 128], strides = [1, 1]} : vector<8x512xf32> to vector<8x128xf32>
    %208 = arith.negf %207 : vector<8x128xf32>
    %209 = math.exp %208 : vector<8x128xf32>
    %cst_89 = arith.constant 1.000000e+00 : f32
    %210 = vector.broadcast %cst_89 : f32 to vector<8x128xf32>
    %211 = arith.addf %210, %209 : vector<8x128xf32>
    %212 = arith.divf %210, %211 : vector<8x128xf32>
    %213 = vector.extract_strided_slice %206 {offsets = [0, 128], sizes = [8, 128], strides = [1, 1]} : vector<8x512xf32> to vector<8x128xf32>
    %214 = arith.negf %213 : vector<8x128xf32>
    %215 = math.exp %214 : vector<8x128xf32>
    %cst_90 = arith.constant 1.000000e+00 : f32
    %216 = vector.broadcast %cst_90 : f32 to vector<8x128xf32>
    %217 = arith.addf %216, %215 : vector<8x128xf32>
    %218 = arith.divf %216, %217 : vector<8x128xf32>
    %219 = vector.extract_strided_slice %206 {offsets = [0, 256], sizes = [8, 128], strides = [1, 1]} : vector<8x512xf32> to vector<8x128xf32>
    %220 = math.tanh %219 : vector<8x128xf32>
    %221 = vector.extract_strided_slice %206 {offsets = [0, 384], sizes = [8, 128], strides = [1, 1]} : vector<8x512xf32> to vector<8x128xf32>
    %222 = arith.negf %221 : vector<8x128xf32>
    %223 = math.exp %222 : vector<8x128xf32>
    %cst_91 = arith.constant 1.000000e+00 : f32
    %224 = vector.broadcast %cst_91 : f32 to vector<8x128xf32>
    %225 = arith.addf %224, %223 : vector<8x128xf32>
    %226 = arith.divf %224, %225 : vector<8x128xf32>
    %227 = arith.mulf %218, %200 : vector<8x128xf32>
    %228 = arith.mulf %212, %220 : vector<8x128xf32>
    %229 = arith.addf %227, %228 : vector<8x128xf32>
    %230 = math.tanh %229 : vector<8x128xf32>
    %231 = arith.mulf %226, %230 : vector<8x128xf32>
    %c0_92 = arith.constant 0 : index
    %c0_93 = arith.constant 0 : index
    %232 = vector.load %arg8[%c0_92, %c0_93] : memref<8x128xf32, #tpu.memory_space<vmem>>, vector<8x128xf32>
    tpu.vector_store %arg8[%c0_92, %c0_93], %231 {strides = array<i32>} : memref<8x128xf32, #tpu.memory_space<vmem>>, vector<8x128xf32>,
    %c0_94 = arith.constant 0 : index
    %c0_95 = arith.constant 0 : index
    %233 = vector.load %arg9[%c0_94, %c0_95] : memref<8x128xf32, #tpu.memory_space<vmem>>, vector<8x128xf32>
    tpu.vector_store %arg9[%c0_94, %c0_95], %229 {strides = array<i32>} : memref<8x128xf32, #tpu.memory_space<vmem>>, vector<8x128xf32>,
    %234 = arith.index_cast %c5_i32 : i32 to index
    %c0_96 = arith.constant 0 : index
    %c0_97 = arith.constant 0 : index
    %235 = vector.load %arg5[%234, %c0_96, %c0_97] : memref<8x8x128xf32, #tpu.memory_space<vmem>>, vector<1x8x128xf32>
    %236 = vector.shape_cast %235 : vector<1x8x128xf32> to vector<8x128xf32>
    %237 = vector.shape_cast %231 : vector<8x128xf32> to vector<1x8x128xf32>
    tpu.vector_store %arg5[%234, %c0_96, %c0_97], %237 {strides = array<i32>} : memref<8x8x128xf32, #tpu.memory_space<vmem>>, vector<1x8x128xf32>,
    %c6_i32 = arith.constant 6 : i32
    %c0_98 = arith.constant 0 : index
    %c0_99 = arith.constant 0 : index
    %238 = vector.load %arg8[%c0_98, %c0_99] : memref<8x128xf32, #tpu.memory_space<vmem>>, vector<8x128xf32>
    %c0_100 = arith.constant 0 : index
    %c0_101 = arith.constant 0 : index
    %239 = vector.load %arg9[%c0_100, %c0_101] : memref<8x128xf32, #tpu.memory_space<vmem>>, vector<8x128xf32>
    %240 = arith.index_cast %c6_i32 : i32 to index
    %c0_102 = arith.constant 0 : index
    %c0_103 = arith.constant 0 : index
    %241 = vector.load %arg1[%240, %c0_102, %c0_103] : memref<8x8x512xf32, #tpu.memory_space<vmem>>, vector<1x8x512xf32>
    %242 = vector.shape_cast %241 : vector<1x8x512xf32> to vector<8x512xf32>
    %243 = arith.truncf %238 : vector<8x128xf32> to vector<8x128xbf16>
    %cst_104 = arith.constant dense<0.000000e+00> : vector<8x512xf32>
    %244 = tpu.matmul %243, %3, %cst_104 {dimension_numbers = #tpu.dot_dimension_numbers<[1], [0], [0], [1], [0, 0, 1, 1], [], []>} : vector<8x128xbf16>, vector<128x512xbf16>, vector<8x512xf32> -> vector<8x512xf32>
    %245 = arith.addf %242, %244 : vector<8x512xf32>
    %246 = vector.extract_strided_slice %245 {offsets = [0, 0], sizes = [8, 128], strides = [1, 1]} : vector<8x512xf32> to vector<8x128xf32>
    %247 = arith.negf %246 : vector<8x128xf32>
    %248 = math.exp %247 : vector<8x128xf32>
    %cst_105 = arith.constant 1.000000e+00 : f32
    %249 = vector.broadcast %cst_105 : f32 to vector<8x128xf32>
    %250 = arith.addf %249, %248 : vector<8x128xf32>
    %251 = arith.divf %249, %250 : vector<8x128xf32>
    %252 = vector.extract_strided_slice %245 {offsets = [0, 128], sizes = [8, 128], strides = [1, 1]} : vector<8x512xf32> to vector<8x128xf32>
    %253 = arith.negf %252 : vector<8x128xf32>
    %254 = math.exp %253 : vector<8x128xf32>
    %cst_106 = arith.constant 1.000000e+00 : f32
    %255 = vector.broadcast %cst_106 : f32 to vector<8x128xf32>
    %256 = arith.addf %255, %254 : vector<8x128xf32>
    %257 = arith.divf %255, %256 : vector<8x128xf32>
    %258 = vector.extract_strided_slice %245 {offsets = [0, 256], sizes = [8, 128], strides = [1, 1]} : vector<8x512xf32> to vector<8x128xf32>
    %259 = math.tanh %258 : vector<8x128xf32>
    %260 = vector.extract_strided_slice %245 {offsets = [0, 384], sizes = [8, 128], strides = [1, 1]} : vector<8x512xf32> to vector<8x128xf32>
    %261 = arith.negf %260 : vector<8x128xf32>
    %262 = math.exp %261 : vector<8x128xf32>
    %cst_107 = arith.constant 1.000000e+00 : f32
    %263 = vector.broadcast %cst_107 : f32 to vector<8x128xf32>
    %264 = arith.addf %263, %262 : vector<8x128xf32>
    %265 = arith.divf %263, %264 : vector<8x128xf32>
    %266 = arith.mulf %257, %239 : vector<8x128xf32>
    %267 = arith.mulf %251, %259 : vector<8x128xf32>
    %268 = arith.addf %266, %267 : vector<8x128xf32>
    %269 = math.tanh %268 : vector<8x128xf32>
    %270 = arith.mulf %265, %269 : vector<8x128xf32>
    %c0_108 = arith.constant 0 : index
    %c0_109 = arith.constant 0 : index
    %271 = vector.load %arg8[%c0_108, %c0_109] : memref<8x128xf32, #tpu.memory_space<vmem>>, vector<8x128xf32>
    tpu.vector_store %arg8[%c0_108, %c0_109], %270 {strides = array<i32>} : memref<8x128xf32, #tpu.memory_space<vmem>>, vector<8x128xf32>,
    %c0_110 = arith.constant 0 : index
    %c0_111 = arith.constant 0 : index
    %272 = vector.load %arg9[%c0_110, %c0_111] : memref<8x128xf32, #tpu.memory_space<vmem>>, vector<8x128xf32>
    tpu.vector_store %arg9[%c0_110, %c0_111], %268 {strides = array<i32>} : memref<8x128xf32, #tpu.memory_space<vmem>>, vector<8x128xf32>,
    %273 = arith.index_cast %c6_i32 : i32 to index
    %c0_112 = arith.constant 0 : index
    %c0_113 = arith.constant 0 : index
    %274 = vector.load %arg5[%273, %c0_112, %c0_113] : memref<8x8x128xf32, #tpu.memory_space<vmem>>, vector<1x8x128xf32>
    %275 = vector.shape_cast %274 : vector<1x8x128xf32> to vector<8x128xf32>
    %276 = vector.shape_cast %270 : vector<8x128xf32> to vector<1x8x128xf32>
    tpu.vector_store %arg5[%273, %c0_112, %c0_113], %276 {strides = array<i32>} : memref<8x8x128xf32, #tpu.memory_space<vmem>>, vector<1x8x128xf32>,
    %c7_i32 = arith.constant 7 : i32
    %c0_114 = arith.constant 0 : index
    %c0_115 = arith.constant 0 : index
    %277 = vector.load %arg8[%c0_114, %c0_115] : memref<8x128xf32, #tpu.memory_space<vmem>>, vector<8x128xf32>
    %c0_116 = arith.constant 0 : index
    %c0_117 = arith.constant 0 : index
    %278 = vector.load %arg9[%c0_116, %c0_117] : memref<8x128xf32, #tpu.memory_space<vmem>>, vector<8x128xf32>
    %279 = arith.index_cast %c7_i32 : i32 to index
    %c0_118 = arith.constant 0 : index
    %c0_119 = arith.constant 0 : index
    %280 = vector.load %arg1[%279, %c0_118, %c0_119] : memref<8x8x512xf32, #tpu.memory_space<vmem>>, vector<1x8x512xf32>
    %281 = vector.shape_cast %280 : vector<1x8x512xf32> to vector<8x512xf32>
    %282 = arith.truncf %277 : vector<8x128xf32> to vector<8x128xbf16>
    %cst_120 = arith.constant dense<0.000000e+00> : vector<8x512xf32>
    %283 = tpu.matmul %282, %3, %cst_120 {dimension_numbers = #tpu.dot_dimension_numbers<[1], [0], [0], [1], [0, 0, 1, 1], [], []>} : vector<8x128xbf16>, vector<128x512xbf16>, vector<8x512xf32> -> vector<8x512xf32>
    %284 = arith.addf %281, %283 : vector<8x512xf32>
    %285 = vector.extract_strided_slice %284 {offsets = [0, 0], sizes = [8, 128], strides = [1, 1]} : vector<8x512xf32> to vector<8x128xf32>
    %286 = arith.negf %285 : vector<8x128xf32>
    %287 = math.exp %286 : vector<8x128xf32>
    %cst_121 = arith.constant 1.000000e+00 : f32
    %288 = vector.broadcast %cst_121 : f32 to vector<8x128xf32>
    %289 = arith.addf %288, %287 : vector<8x128xf32>
    %290 = arith.divf %288, %289 : vector<8x128xf32>
    %291 = vector.extract_strided_slice %284 {offsets = [0, 128], sizes = [8, 128], strides = [1, 1]} : vector<8x512xf32> to vector<8x128xf32>
    %292 = arith.negf %291 : vector<8x128xf32>
    %293 = math.exp %292 : vector<8x128xf32>
    %cst_122 = arith.constant 1.000000e+00 : f32
    %294 = vector.broadcast %cst_122 : f32 to vector<8x128xf32>
    %295 = arith.addf %294, %293 : vector<8x128xf32>
    %296 = arith.divf %294, %295 : vector<8x128xf32>
    %297 = vector.extract_strided_slice %284 {offsets = [0, 256], sizes = [8, 128], strides = [1, 1]} : vector<8x512xf32> to vector<8x128xf32>
    %298 = math.tanh %297 : vector<8x128xf32>
    %299 = vector.extract_strided_slice %284 {offsets = [0, 384], sizes = [8, 128], strides = [1, 1]} : vector<8x512xf32> to vector<8x128xf32>
    %300 = arith.negf %299 : vector<8x128xf32>
    %301 = math.exp %300 : vector<8x128xf32>
    %cst_123 = arith.constant 1.000000e+00 : f32
    %302 = vector.broadcast %cst_123 : f32 to vector<8x128xf32>
    %303 = arith.addf %302, %301 : vector<8x128xf32>
    %304 = arith.divf %302, %303 : vector<8x128xf32>
    %305 = arith.mulf %296, %278 : vector<8x128xf32>
    %306 = arith.mulf %290, %298 : vector<8x128xf32>
    %307 = arith.addf %305, %306 : vector<8x128xf32>
    %308 = math.tanh %307 : vector<8x128xf32>
    %309 = arith.mulf %304, %308 : vector<8x128xf32>
    %c0_124 = arith.constant 0 : index
    %c0_125 = arith.constant 0 : index
    %310 = vector.load %arg8[%c0_124, %c0_125] : memref<8x128xf32, #tpu.memory_space<vmem>>, vector<8x128xf32>
    tpu.vector_store %arg8[%c0_124, %c0_125], %309 {strides = array<i32>} : memref<8x128xf32, #tpu.memory_space<vmem>>, vector<8x128xf32>,
    %c0_126 = arith.constant 0 : index
    %c0_127 = arith.constant 0 : index
    %311 = vector.load %arg9[%c0_126, %c0_127] : memref<8x128xf32, #tpu.memory_space<vmem>>, vector<8x128xf32>
    tpu.vector_store %arg9[%c0_126, %c0_127], %307 {strides = array<i32>} : memref<8x128xf32, #tpu.memory_space<vmem>>, vector<8x128xf32>,
    %312 = arith.index_cast %c7_i32 : i32 to index
    %c0_128 = arith.constant 0 : index
    %c0_129 = arith.constant 0 : index
    %313 = vector.load %arg5[%312, %c0_128, %c0_129] : memref<8x8x128xf32, #tpu.memory_space<vmem>>, vector<1x8x128xf32>
    %314 = vector.shape_cast %313 : vector<1x8x128xf32> to vector<8x128xf32>
    %315 = vector.shape_cast %309 : vector<8x128xf32> to vector<1x8x128xf32>
    tpu.vector_store %arg5[%312, %c0_128, %c0_129], %315 {strides = array<i32>} : memref<8x8x128xf32, #tpu.memory_space<vmem>>, vector<1x8x128xf32>,
    %c8_i32 = arith.constant 8 : i32
    %c0_i32_130 = arith.constant 0 : i32
    %316 = arith.cmpi eq, %arg0, %c0_i32_130 : i32
    %317 = arith.extui %316 : i1 to i32
    %c0_i32_131 = arith.constant 0 : i32
    %318 = arith.cmpi ne, %317, %c0_i32_131 : i32
    scf.if %318 {
      %c0_132 = arith.constant 0 : index
      %c0_133 = arith.constant 0 : index
      %319 = vector.load %arg8[%c0_132, %c0_133] : memref<8x128xf32, #tpu.memory_space<vmem>>, vector<8x128xf32>
      %c0_134 = arith.constant 0 : index
      %c0_135 = arith.constant 0 : index
      %320 = vector.load %arg6[%c0_134, %c0_135] : memref<8x128xf32, #tpu.memory_space<vmem>>, vector<8x128xf32>
      tpu.vector_store %arg6[%c0_134, %c0_135], %319 {strides = array<i32>} : memref<8x128xf32, #tpu.memory_space<vmem>>, vector<8x128xf32>,
      %c0_136 = arith.constant 0 : index
      %c0_137 = arith.constant 0 : index
      %321 = vector.load %arg9[%c0_136, %c0_137] : memref<8x128xf32, #tpu.memory_space<vmem>>, vector<8x128xf32>
      %c0_138 = arith.constant 0 : index
      %c0_139 = arith.constant 0 : index
      %322 = vector.load %arg7[%c0_138, %c0_139] : memref<8x128xf32, #tpu.memory_space<vmem>>, vector<8x128xf32>
      tpu.vector_store %arg7[%c0_138, %c0_139], %321 {strides = array<i32>} : memref<8x128xf32, #tpu.memory_space<vmem>>, vector<8x128xf32>,
    } else {
    }
    return
  }
  func.func @transform_0(%arg0: i32) -> (i32, i32, i32) {
    %c0_i32 = arith.constant 0 : i32
    %c0_i32_0 = arith.constant 0 : i32
    %c0_i32_1 = arith.constant 0 : i32
    return %arg0, %c0_i32, %c0_i32_0 : i32, i32, i32
  }
  func.func @transform_1(%arg0: i32) -> (i32, i32) {
    %c0_i32 = arith.constant 0 : i32
    %c0_i32_0 = arith.constant 0 : i32
    %c0_i32_1 = arith.constant 0 : i32
    return %c0_i32, %c0_i32_0 : i32, i32
  }
  func.func @transform_2(%arg0: i32) -> (i32, i32) {
    %c0_i32 = arith.constant 0 : i32
    %c0_i32_0 = arith.constant 0 : i32
    %c0_i32_1 = arith.constant 0 : i32
    return %c0_i32, %c0_i32_0 : i32, i32
  }
  func.func @transform_3(%arg0: i32) -> (i32, i32) {
    %c0_i32 = arith.constant 0 : i32
    %c0_i32_0 = arith.constant 0 : i32
    %c0_i32_1 = arith.constant 0 : i32
    return %c0_i32, %c0_i32_0 : i32, i32
  }
  func.func @transform_4(%arg0: i32) -> (i32, i32, i32) {
    %c0_i32 = arith.constant 0 : i32
    %c0_i32_0 = arith.constant 0 : i32
    %c0_i32_1 = arith.constant 0 : i32
    return %arg0, %c0_i32, %c0_i32_0 : i32, i32, i32
  }
  func.func @transform_5(%arg0: i32) -> (i32, i32) {
    %c0_i32 = arith.constant 0 : i32
    %c0_i32_0 = arith.constant 0 : i32
    %c0_i32_1 = arith.constant 0 : i32
    return %c0_i32, %c0_i32_0 : i32, i32
  }
  func.func @transform_6(%arg0: i32) -> (i32, i32) {
    %c0_i32 = arith.constant 0 : i32
    %c0_i32_0 = arith.constant 0 : i32
    %c0_i32_1 = arith.constant 0 : i32
    return %c0_i32, %c0_i32_0 : i32, i32
  }
}

</mosaic_0001>

<bundles_post_ra>
// kernel: tpu_custom_call.1
= control target key start
LH: loop header
LB: loop body
LE: loop exit
PB: predicated region body
PF: predicated region fallthrough
CT: control target
= control target key end

     0   :  { %12 = vsyncpa [#allocation5], 0  ;;  %s2127_s0 = inlined_call_operand.hbm [shape: f32[8,8,512], index: 0, kind: input, shape index: {}]   ;;  %s2128_s1 = inlined_call_operand.hbm [shape: bf16[128,512], index: 1, kind: input, shape index: {}]   ;;  %s2129_s2 = inlined_call_operand.hbm [shape: f32[8,128], index: 2, kind: input, shape index: {}]   ;;  %s2130_s3 = inlined_call_operand.hbm [shape: f32[8,128], index: 3, kind: input, shape index: {}]   ;;  %s2131_s4 = inlined_call_operand.hbm [shape: f32[8,8,128], index: 4, kind: output, shape index: {0}]   ;;  %s2132_s5 = inlined_call_operand.hbm [shape: f32[8,128], index: 5, kind: output, shape index: {1}]   ;;  %s2133_s6 = inlined_call_operand.hbm [shape: f32[8,128], index: 6, kind: output, shape index: {2}]  }
   0x1   :  { %13 = vsyncpa [#allocation8], 0 }
   0x2   :  { %14 = vsyncpa [#allocation11], 0 }
   0x3   :  { %15 = vsyncpa [#allocation6], 0 }
   0x4   :  { %16 = vsyncpa [#allocation14], 0  ;;  %s1729_s21 = smov [#allocation7]  }
   0x5   :  { %s34_s22 = sshll.u32 %s1729_s21, 4  ;;  %s35_s22 = int_to_ptr.vmem [resolvable:$true] %s34_s22 }
   0x6   :  { %s1587_s23 = scalar_lea.vmem %s35_s22, 4096  ;;  %p1592_p1 = scmp.lt.s32.totalorder %s35_s22, %s35_s22 }
   0x7   :  { %p1588_p0 = scmp.ne.s32.totalorder %s35_s22, %s1587_s23  ;;  %p1593_p2 = scmp.lt.s32.totalorder %s1587_s23, %s1587_s23 }
   0x9   :  { %p1594_p3 = por %p1593_p2, %p1592_p1 }
   0xb   :  { %p1595_p4 = pnand %p1594_p3, %p1588_p0 }
   0xd   :  { %1598 = shalt.err (!%p1595_p4)
}
   0xe   :  { %s1730_s24 = smov 256   ;;  %s1731_s25 = smov 16  }
   0xf   :  { %40 = dma.hbm_to_vmem [thread:$0]  %s2128_s1, 4096, %s35_s22, [#allocation8], %s1730_s24, %s1730_s24, %s1731_s25  }
  0x10   :  { %s1732_s28 = smov [#allocation4]  }
  0x11   :  { %s22_s29 = sshll.u32 %s1732_s28, 4  ;;  %s23_s29 = int_to_ptr.vmem [resolvable:$true] %s22_s29 }
  0x12   :  { %s1607_s30 = scalar_lea.vmem %s23_s29, 4096  ;;  %p1612_p6 = scmp.lt.s32.totalorder %s23_s29, %s23_s29 }
  0x13   :  { %p1608_p5 = scmp.ne.s32.totalorder %s23_s29, %s1607_s30  ;;  %p1613_p7 = scmp.lt.s32.totalorder %s1607_s30, %s1607_s30 }
  0x15   :  { %p1614_p8 = por %p1613_p7, %p1612_p6 }
  0x17   :  { %p1615_p9 = pnand %p1614_p8, %p1608_p5 }
  0x19   :  { %1618 = shalt.err (!%p1615_p9)
}
  0x1a   :  { %s1733_s7 = smov 512   ;;  %s1734_s8 = smov 32  }
  0x1b   :  { %28 = dma.hbm_to_vmem [thread:$0]  %s2127_s0, 4096, %s23_s29, [#allocation5], %s1733_s7, %s1733_s7, %s1734_s8  }
  0x1c   :  { %s1735_s11 = smov [#allocation9]   ;;  %s1736_s13 = smov [#allocation10]  }
  0x1d   :  { %s47_s12 = sshll.u32 %s1735_s11, 4  ;;  %s57_s1 = sshll.u32 %s1736_s13, 4  ;;  %s48_s12 = int_to_ptr.vmem [resolvable:$true] %s47_s12  ;;  %s58_s1 = int_to_ptr.vmem [resolvable:$true] %s57_s1 }
  0x1e   :  { %s1627_s14 = scalar_lea.vmem %s48_s12, 128  ;;  %p1632_p11 = scmp.lt.s32.totalorder %s48_s12, %s48_s12 }
  0x1f   :  { %p1628_p10 = scmp.ne.s32.totalorder %s48_s12, %s1627_s14  ;;  %p1633_p12 = scmp.lt.s32.totalorder %s1627_s14, %s1627_s14 }
  0x21   :  { %p1634_p13 = por %p1633_p12, %p1632_p11 }
  0x23   :  { %p1635_p0 = pnand %p1634_p13, %p1628_p10 }
  0x25   :  { %1638 = shalt.err (!%p1635_p0)
}
  0x26   :  { %50 = dma.hbm_to_vmem [thread:$0]  %s2129_s2, 128, %s48_s12, [#allocation8]  }
  0x27   :  { %s1647_s17 = scalar_lea.vmem %s58_s1, 128  ;;  %p1652_p2 = scmp.lt.s32.totalorder %s58_s1, %s58_s1 }
  0x28   :  { %p1648_p1 = scmp.ne.s32.totalorder %s58_s1, %s1647_s17  ;;  %p1653_p3 = scmp.lt.s32.totalorder %s1647_s17, %s1647_s17 }
  0x2a   :  { %p1654_p4 = por %p1653_p3, %p1652_p2 }
  0x2c   :  { %p1655_p5 = pnand %p1654_p4, %p1648_p1 }
  0x2e   :  { %1658 = shalt.err (!%p1655_p5)
}
  0x2f   :  { %60 = dma.hbm_to_vmem [thread:$0]  %s2130_s3, 128, %s58_s1, [#allocation11]  }
  0x30   :  { %1719 = dma.done.wait [#allocation5], 4096  }
  0x31   :  { %1720 = vsyncadd [#allocation5], 4294963200 }
  0x32   :  { %1721 = dma.done.wait [#allocation8], 4224  }
  0x33   :  { %1722 = vsyncadd [#allocation8], 4294963072 }
  0x34   :  { %1723 = dma.done.wait [#allocation11], 128  }
  0x35   :  { %1724 = vsyncadd [#allocation11], 4294967168  ;;  %v1737_v0 = vmov 0   ;;  %v1792_v1 = vld [vmem:[#allocation7 + $0xe4] ss:$16 sps:$4 sm:$0xff]   ;;  %v117_v37 = vld [vmem:[#allocation4 + $0x8] sm:$0xff] }
  0x36   :  { %313 = vmatprep.mubr.bf16.mxu0 %v1737_v0  ;;  %354 = vmatprep.mubr.bf16.mxu1 %v1737_v0  ;;  %v1794_v2 = vld [vmem:[#allocation7 + $0xe0] ss:$16 sps:$4 sm:$0xff]   ;;  %v1797_v3 = vld [vmem:[#allocation7 + $0xc4] ss:$16 sps:$4 sm:$0xff]   ;;  %v1805_v6 = vld [vmem:[#allocation7 + $0xec] ss:$16 sps:$4 sm:$0xff]  }
  0x37   :  { %281 = vmatprep.subr.bf16.mxu0 %v1792_v1  ;;  %v1800_v4 = vld [vmem:[#allocation7 + $0xc0] ss:$16 sps:$4 sm:$0xff]   ;;  %v1803_v5 = vld [vmem:[#allocation7 + $0xa4] ss:$16 sps:$4 sm:$0xff]   ;;  %v1807_v7 = vld [vmem:[#allocation7 + $0xe8] ss:$16 sps:$4 sm:$0xff]   ;;  %322 = vmatprep.subr.bf16.mxu1 %v1805_v6 }
  0x38   :  { %282 = vmatpush1.bf16.msra.mxu0 %v1794_v2  ;;  %v1810_v8 = vld [vmem:[#allocation7 + $0xa0] ss:$16 sps:$4 sm:$0xff]   ;;  %v1814_v9 = vld [vmem:[#allocation7 + $0x84] ss:$16 sps:$4 sm:$0xff]   ;;  %323 = vmatpush1.bf16.msra.mxu1 %v1807_v7  ;;  %v1817_v10 = vld [vmem:[#allocation7 + $0xcc] ss:$16 sps:$4 sm:$0xff]  }
  0x39   :  { %283 = vmatprep.subr.bf16.mxu0 %v1797_v3  ;;  %v1819_v11 = vld [vmem:[#allocation7 + $0xc8] ss:$16 sps:$4 sm:$0xff]   ;;  %324 = vmatprep.subr.bf16.mxu1 %v1817_v10  ;;  %v1823_v12 = vld [vmem:[#allocation7 + $0x80] ss:$16 sps:$4 sm:$0xff]   ;;  %v1825_v13 = vld [vmem:[#allocation7 + $0x64] ss:$16 sps:$4 sm:$0xff]  }
  0x3a   :  { %v1827_v14 = vld [vmem:[#allocation7 + $0xac] ss:$16 sps:$4 sm:$0xff]   ;;  %v1831_v15 = vld [vmem:[#allocation7 + $0xa8] ss:$16 sps:$4 sm:$0xff]   ;;  %v1837_v17 = vld [vmem:[#allocation7 + $0x60] ss:$16 sps:$4 sm:$0xff]  }
  0x3b   :  { %v1834_v16 = vld [vmem:[#allocation7 + $0x8c] ss:$16 sps:$4 sm:$0xff]   ;;  %v1840_v18 = vld [vmem:[#allocation7 + $0x44] ss:$16 sps:$4 sm:$0xff]   ;;  %v1843_v19 = vld [vmem:[#allocation7 + $0x88] ss:$16 sps:$4 sm:$0xff]  }
  0x3c   :  { %284 = vmatpush1.bf16.msra.mxu0 %v1800_v4  ;;  %325 = vmatpush1.bf16.msra.mxu1 %v1819_v11  ;;  %v1846_v20 = vld [vmem:[#allocation7 + $0x6c] ss:$16 sps:$4 sm:$0xff]   ;;  %v1848_v21 = vld [vmem:[#allocation7 + $0x40] ss:$16 sps:$4 sm:$0xff]   ;;  %v1851_v22 = vld [vmem:[#allocation7 + $0x24] ss:$16 sps:$4 sm:$0xff]  }
  0x3d   :  { %285 = vmatprep.subr.bf16.mxu0 %v1803_v5  ;;  %326 = vmatprep.subr.bf16.mxu1 %v1827_v14  ;;  %v1855_v23 = vld [vmem:[#allocation7 + $0x68] ss:$16 sps:$4 sm:$0xff]   ;;  %v1858_v24 = vld [vmem:[#allocation7 + $0x4c] ss:$16 sps:$4 sm:$0xff]   ;;  %v1861_v25 = vld [vmem:[#allocation7 + $0x20] ss:$16 sps:$4 sm:$0xff]  }
  0x3e   :  { %v1864_v26 = vld [vmem:[#allocation7 + $0x4] ss:$16 sps:$4 sm:$0xff]   ;;  %v1867_v27 = vld [vmem:[#allocation7 + $0x48] ss:$16 sps:$4 sm:$0xff]   ;;  %v1870_v28 = vld [vmem:[#allocation7 + $0x2c] ss:$16 sps:$4 sm:$0xff]  }
  0x3f   :  { %v1873_v29 = vld [vmem:[#allocation7] ss:$16 sps:$4 sm:$0xff]   ;;  %v1877_v31 = vld [vmem:[#allocation7 + $0x28] ss:$16 sps:$4 sm:$0xff]   ;;  %v1880_v32 = vld [vmem:[#allocation7 + $0xc] ss:$16 sps:$4 sm:$0xff]  }
  0x40   :  { %286 = vmatpush1.bf16.msra.mxu0 %v1810_v8  ;;  %327 = vmatpush1.bf16.msra.mxu1 %v1831_v15  ;;  %v78_v30 = vld [vmem:[#allocation9] sm:$0xff]  ;;  %v1884_v34 = vld [vmem:[#allocation7 + $0x8] ss:$16 sps:$4 sm:$0xff]   ;;  %v118_v50 = vld [vmem:[#allocation4 + $0x10] sm:$0xff]  ;;  %s1738_s2 = smov [#allocation13]   ;;  %s1739_s19 = smov [#allocation12]  }
  0x41   :  { %287 = vmatprep.subr.bf16.mxu0 %v1814_v9  ;;  %328 = vmatprep.subr.bf16.mxu1 %v1834_v16  ;;  %v120_v33 = vpack.c.bf16 %v78_v30, %v78_v30  ;;  %v116_v35 = vld [vmem:[#allocation4] sm:$0xff]  ;;  %v119_v47 = vld [vmem:[#allocation4 + $0x18] sm:$0xff]  ;;  %v80_v61 = vld [vmem:[#allocation10] sm:$0xff]  ;;  %s1273_s3 = sshll.u32 %s1738_s2, 4  ;;  %s1260_s20 = sshll.u32 %s1739_s19, 4  ;;  %s1274_s3 = int_to_ptr.vmem [resolvable:$true] %s1273_s3  ;;  %s1261_s20 = int_to_ptr.vmem [resolvable:$true] %s1260_s20 }
  0x42   :  { %s1740_s21 = smov [#allocation15]   ;;  %s1659_s23 = scalar_lea.vmem %s1274_s3, 128 }
  0x43   :  { %s1283_s22 = sshll.u32 %s1740_s21, 4  ;;  %p1660_p6 = scmp.ne.s32.totalorder %s1274_s3, %s1659_s23  ;;  %s1284_s22 = int_to_ptr.vmem [resolvable:$true] %s1283_s22 }
  0x44   :  { %288 = vmatpush1.bf16.msra.mxu0 %v1823_v12  ;;  %329 = vmatpush1.bf16.msra.mxu1 %v1843_v19  ;;  %p1664_p7 = scmp.lt.s32.totalorder %s1274_s3, %s1274_s3  ;;  %p1665_p8 = scmp.lt.s32.totalorder %s1659_s23, %s1659_s23 }
  0x45   :  { %289 = vmatprep.subr.bf16.mxu0 %v1825_v13  ;;  %330 = vmatprep.subr.bf16.mxu1 %v1846_v20 }
  0x46   :  { %p1666_p9 = por %p1665_p8, %p1664_p7 }
  0x48   :  { %290 = vmatpush1.bf16.msra.mxu0 %v1837_v17  ;;  %331 = vmatpush1.bf16.msra.mxu1 %v1855_v23  ;;  %p1667_p10 = pnand %p1666_p9, %p1660_p6 }
  0x49   :  { %291 = vmatprep.subr.bf16.mxu0 %v1840_v18  ;;  %332 = vmatprep.subr.bf16.mxu1 %v1858_v24 }
  0x4c   :  { %292 = vmatpush1.bf16.msra.mxu0 %v1848_v21  ;;  %333 = vmatpush1.bf16.msra.mxu1 %v1867_v27 }
  0x4d   :  { %293 = vmatprep.subr.bf16.mxu0 %v1851_v22  ;;  %334 = vmatprep.subr.bf16.mxu1 %v1870_v28 }
  0x50   :  { %294 = vmatpush1.bf16.msra.mxu0 %v1861_v25  ;;  %335 = vmatpush1.bf16.msra.mxu1 %v1877_v31 }
  0x51   :  { %295 = vmatprep.subr.bf16.mxu0 %v1864_v26  ;;  %336 = vmatprep.subr.bf16.mxu1 %v1880_v32 }
  0x54   :  { %296 = vmatpush1.bf16.msra.mxu0 %v1873_v29  ;;  %337 = vmatpush1.bf16.msra.mxu1 %v1884_v34 }
  0x55   :  { %402 = vmatprep.subr.bf16.mxu0 %v1792_v1  ;;  %443 = vmatprep.subr.bf16.mxu1 %v1805_v6 }
  0x57   :  { %314 = vmatmul.mubr.bf16.vlgmr.msra.gmra.mxu0 %v120_v33  ;;  %355 = vmatmul.mubr.bf16.vlgmr.msra.gmra.mxu1 %v120_v33 }
  0x58   :  { %403 = vmatpush1.bf16.msra.mxu0 %v1794_v2  ;;  %434 = vmatprep.mubr.bf16.mxu0 %v1737_v0 }
  0x59   :  { %404 = vmatprep.subr.bf16.mxu0 %v1797_v3  ;;  %444 = vmatpush1.bf16.msra.mxu1 %v1807_v7 }
  0x5a   :  { %445 = vmatprep.subr.bf16.mxu1 %v1817_v10  ;;  %475 = vmatprep.mubr.bf16.mxu1 %v1737_v0 }
  0x5c   :  { %405 = vmatpush1.bf16.msra.mxu0 %v1800_v4 }
  0x5d   :  { %406 = vmatprep.subr.bf16.mxu0 %v1803_v5  ;;  %446 = vmatpush1.bf16.msra.mxu1 %v1819_v11 }
  0x5e   :  { %447 = vmatprep.subr.bf16.mxu1 %v1827_v14 }
  0x60   :  { %407 = vmatpush1.bf16.msra.mxu0 %v1810_v8 }
  0x61   :  { %408 = vmatprep.subr.bf16.mxu0 %v1814_v9  ;;  %448 = vmatpush1.bf16.msra.mxu1 %v1831_v15 }
  0x62   :  { %449 = vmatprep.subr.bf16.mxu1 %v1834_v16 }
  0x64   :  { %409 = vmatpush1.bf16.msra.mxu0 %v1823_v12 }
  0x65   :  { %410 = vmatprep.subr.bf16.mxu0 %v1825_v13  ;;  %450 = vmatpush1.bf16.msra.mxu1 %v1843_v19 }
  0x66   :  { %451 = vmatprep.subr.bf16.mxu1 %v1846_v20 }
  0x68   :  { %411 = vmatpush1.bf16.msra.mxu0 %v1837_v17 }
  0x69   :  { %412 = vmatprep.subr.bf16.mxu0 %v1840_v18  ;;  %452 = vmatpush1.bf16.msra.mxu1 %v1855_v23 }
  0x6a   :  { %453 = vmatprep.subr.bf16.mxu1 %v1858_v24 }
  0x6c   :  { %413 = vmatpush1.bf16.msra.mxu0 %v1848_v21 }
  0x6d   :  { %414 = vmatprep.subr.bf16.mxu0 %v1851_v22  ;;  %454 = vmatpush1.bf16.msra.mxu1 %v1867_v27 }
  0x6e   :  { %455 = vmatprep.subr.bf16.mxu1 %v1870_v28 }
  0x70   :  { %415 = vmatpush1.bf16.msra.mxu0 %v1861_v25 }
  0x71   :  { %416 = vmatprep.subr.bf16.mxu0 %v1864_v26  ;;  %456 = vmatpush1.bf16.msra.mxu1 %v1877_v31 }
  0x72   :  { %457 = vmatprep.subr.bf16.mxu1 %v1880_v32 }
  0x74   :  { %417 = vmatpush1.bf16.msra.mxu0 %v1873_v29 }
  0x75   :  { %524 = vmatprep.subr.bf16.mxu0 %v1792_v1  ;;  %458 = vmatpush1.bf16.msra.mxu1 %v1884_v34 }
  0x76   :  { %565 = vmatprep.subr.bf16.mxu1 %v1805_v6 }
 0x117   :  { %v315_v36 = vpop.f32.mrf.mxu0  ;;  %v356_v44 = vpop.f32.mrf.mxu1 }
 0x118   :  { %v363_v38 = vadd.f32 %v315_v36, %v116_v35  ;;  %v365_v52 = vadd.f32 %v356_v44, %v118_v50 }
 0x119   :  { %v317_v39 = vpop.f32.mrf.mxu0  ;;  %v358_v46 = vpop.f32.mrf.mxu1 }
 0x11a   :  { %v1333_v40 = vmul.f32 -1.442695, %v363_v38  ;;  %v364_v41 = vadd.f32 %v317_v39, %v117_v37  ;;  %v366_v51 = vadd.f32 %v358_v46, %v119_v47 }
 0x11b   :  { %v319_v42 = vpop.f32.mrf.mxu0  ;;  %v360_v48 = vpop.f32.mrf.mxu1 }
 0x11c   :  { %1419 = vpow2.f32 %v1333_v40  ;;  %v1334_v43 = vmul.f32 -1.442695, %v364_v41  ;;  %v1335_v53 = vmul.f32 -1.442695, %v366_v51  ;;  %v397_v40 = vld [vmem:[#allocation4 + $0x20] sm:$0xff] }
 0x11d   :  { %v320_v45 = vpop.f32.mrf.mxu0  ;;  %v361_v49 = vpop.f32.mrf.mxu1 }
 0x11e   :  { %1421 = vpow2.f32 %v1334_v43  ;;  %v398_v43 = vld [vmem:[#allocation4 + $0x28] sm:$0xff] }
 0x11f   :  { %1423 = vtanh.f32 %v365_v52 }
 0x120   :  { %1425 = vpow2.f32 %v1335_v53 }
 0x129   :  { %v1420_v54 = vpop.eup %1419 }
 0x12a   :  { %v370_v55 = vadd.f32 1.0, %v1420_v54  ;;  %v400_v54 = vld [vmem:[#allocation4 + $0x38] sm:$0xff] }
 0x12b   :  { %v1422_v56 = vpop.eup %1421 }
 0x12c   :  { %1427 = vrcp.f32 %v370_v55  ;;  %v376_v57 = vadd.f32 1.0, %v1422_v56  ;;  %v1424_v58 = vpop.eup %1423  ;;  %v399_v56 = vld [vmem:[#allocation4 + $0x30] sm:$0xff] }
 0x12d   :  { %v1426_v59 = vpop.eup %1425 }
 0x12e   :  { %1429 = vrcp.f32 %v376_v57  ;;  %v383_v63 = vadd.f32 1.0, %v1426_v59 }
 0x130   :  { %1431 = vrcp.f32 %v383_v63 }
 0x139   :  { %v1428_v60 = vpop.eup %1427 }
 0x13a   :  { %v387_v33 = vmul.f32 %v1428_v60, %v1424_v58 }
 0x13b   :  { %v1430_v62 = vpop.eup %1429 }
 0x13c   :  { %v386_v30 = vmul.f32 %v1430_v62, %v80_v61 }
 0x13d   :  { %v1432_v36 = vpop.eup %1431 }
 0x13e   :  { %v1924_v35 = vadd.f32 %v387_v33, %v386_v30 }
 0x140   :  { %1433 = vtanh.f32 %v1924_v35 }
 0x14d   :  { %v1434_v37 = vpop.eup %1433 }
 0x14e   :  { %v390_v38 = vmul.f32 %v1434_v37, %v1432_v36 }
 0x150   :  { %393 = vst [vmem:[#allocation12] sm:$0xff] %v390_v38  ;;  %v401_v39 = vpack.c.bf16 %v390_v38, %v390_v38 }
 0x152   :  { %435 = vmatmul.mubr.bf16.vlgmr.msra.gmra.mxu0 %v401_v39  ;;  %476 = vmatmul.mubr.bf16.vlgmr.msra.gmra.mxu1 %v401_v39 }
 0x153   :  { %525 = vmatpush1.bf16.msra.mxu0 %v1794_v2  ;;  %566 = vmatpush1.bf16.msra.mxu1 %v1807_v7 }
 0x154   :  { %526 = vmatprep.subr.bf16.mxu0 %v1797_v3  ;;  %567 = vmatprep.subr.bf16.mxu1 %v1817_v10 }
 0x155   :  { %556 = vmatprep.mubr.bf16.mxu0 %v1737_v0  ;;  %597 = vmatprep.mubr.bf16.mxu1 %v1737_v0 }
 0x157   :  { %527 = vmatpush1.bf16.msra.mxu0 %v1800_v4  ;;  %568 = vmatpush1.bf16.msra.mxu1 %v1819_v11 }
 0x158   :  { %528 = vmatprep.subr.bf16.mxu0 %v1803_v5  ;;  %569 = vmatprep.subr.bf16.mxu1 %v1827_v14 }
 0x15b   :  { %529 = vmatpush1.bf16.msra.mxu0 %v1810_v8  ;;  %570 = vmatpush1.bf16.msra.mxu1 %v1831_v15 }
 0x15c   :  { %530 = vmatprep.subr.bf16.mxu0 %v1814_v9  ;;  %571 = vmatprep.subr.bf16.mxu1 %v1834_v16 }
 0x15f   :  { %531 = vmatpush1.bf16.msra.mxu0 %v1823_v12  ;;  %572 = vmatpush1.bf16.msra.mxu1 %v1843_v19 }
 0x160   :  { %532 = vmatprep.subr.bf16.mxu0 %v1825_v13  ;;  %573 = vmatprep.subr.bf16.mxu1 %v1846_v20 }
 0x163   :  { %533 = vmatpush1.bf16.msra.mxu0 %v1837_v17  ;;  %574 = vmatpush1.bf16.msra.mxu1 %v1855_v23 }
 0x164   :  { %534 = vmatprep.subr.bf16.mxu0 %v1840_v18  ;;  %575 = vmatprep.subr.bf16.mxu1 %v1858_v24 }
 0x167   :  { %535 = vmatpush1.bf16.msra.mxu0 %v1848_v21  ;;  %576 = vmatpush1.bf16.msra.mxu1 %v1867_v27 }
 0x168   :  { %536 = vmatprep.subr.bf16.mxu0 %v1851_v22  ;;  %577 = vmatprep.subr.bf16.mxu1 %v1870_v28 }
 0x16b   :  { %537 = vmatpush1.bf16.msra.mxu0 %v1861_v25  ;;  %578 = vmatpush1.bf16.msra.mxu1 %v1877_v31 }
 0x16c   :  { %538 = vmatprep.subr.bf16.mxu0 %v1864_v26  ;;  %579 = vmatprep.subr.bf16.mxu1 %v1880_v32 }
 0x16f   :  { %539 = vmatpush1.bf16.msra.mxu0 %v1873_v29  ;;  %580 = vmatpush1.bf16.msra.mxu1 %v1884_v34 }
 0x170   :  { %646 = vmatprep.subr.bf16.mxu0 %v1792_v1  ;;  %687 = vmatprep.subr.bf16.mxu1 %v1805_v6 }
 0x212   :  { %v436_v41 = vpop.f32.mrf.mxu0  ;;  %v477_v42 = vpop.f32.mrf.mxu1 }
 0x213   :  { %v484_v44 = vadd.f32 %v436_v41, %v397_v40  ;;  %v486_v59 = vadd.f32 %v477_v42, %v399_v56 }
 0x214   :  { %v438_v45 = vpop.f32.mrf.mxu0  ;;  %v479_v46 = vpop.f32.mrf.mxu1 }
 0x215   :  { %v1336_v47 = vmul.f32 -1.442695, %v484_v44  ;;  %v485_v48 = vadd.f32 %v438_v45, %v398_v43  ;;  %v487_v55 = vadd.f32 %v479_v46, %v400_v54 }
 0x216   :  { %v440_v49 = vpop.f32.mrf.mxu0  ;;  %v481_v50 = vpop.f32.mrf.mxu1 }
 0x217   :  { %1435 = vpow2.f32 %v1336_v47  ;;  %v1337_v51 = vmul.f32 -1.442695, %v485_v48  ;;  %v1338_v57 = vmul.f32 -1.442695, %v487_v55  ;;  %v520_v47 = vld [vmem:[#allocation4 + $0x48] sm:$0xff] }
 0x218   :  { %v441_v52 = vpop.f32.mrf.mxu0  ;;  %v482_v53 = vpop.f32.mrf.mxu1 }
 0x219   :  { %1437 = vpow2.f32 %v1337_v51 }
 0x21a   :  { %1439 = vpow2.f32 %v1338_v57 }
 0x224   :  { %v1436_v58 = vpop.eup %1435 }
 0x225   :  { %v491_v60 = vadd.f32 1.0, %v1436_v58  ;;  %v522_v58 = vld [vmem:[#allocation4 + $0x58] sm:$0xff] }
 0x226   :  { %v1438_v61 = vpop.eup %1437 }
 0x227   :  { %1441 = vrcp.f32 %v491_v60  ;;  %v497_v62 = vadd.f32 1.0, %v1438_v61  ;;  %v1440_v63 = vpop.eup %1439  ;;  %v521_v60 = vld [vmem:[#allocation4 + $0x50] sm:$0xff] }
 0x228   :  { %1443 = vtanh.f32 %v486_v59  ;;  %v504_v37 = vadd.f32 1.0, %v1440_v63 }
 0x229   :  { %1445 = vrcp.f32 %v497_v62 }
 0x22a   :  { %1447 = vrcp.f32 %v504_v37 }
 0x234   :  { %v1442_v30 = vpop.eup %1441 }
 0x235   :  { %v1444_v33 = vpop.eup %1443 }
 0x236   :  { %v1446_v36 = vpop.eup %1445  ;;  %v508_v38 = vmul.f32 %v1444_v33, %v1442_v30 }
 0x237   :  { %v507_v39 = vmul.f32 %v1446_v36, %v1924_v35  ;;  %v1448_v41 = vpop.eup %1447  ;;  %v519_v35 = vld [vmem:[#allocation4 + $0x40] sm:$0xff] }
 0x239   :  { %v1962_v40 = vadd.f32 %v508_v38, %v507_v39 }
 0x23b   :  { %1449 = vtanh.f32 %v1962_v40 }
 0x248   :  { %v1450_v42 = vpop.eup %1449 }
 0x249   :  { %v511_v43 = vmul.f32 %v1450_v42, %v1448_v41 }
 0x24b   :  { %515 = vst [vmem:[#allocation12 + $0x8] sm:$0xff] %v511_v43  ;;  %v523_v44 = vpack.c.bf16 %v511_v43, %v511_v43 }
 0x24d   :  { %557 = vmatmul.mubr.bf16.vlgmr.msra.gmra.mxu0 %v523_v44  ;;  %598 = vmatmul.mubr.bf16.vlgmr.msra.gmra.mxu1 %v523_v44 }
 0x24e   :  { %647 = vmatpush1.bf16.msra.mxu0 %v1794_v2  ;;  %688 = vmatpush1.bf16.msra.mxu1 %v1807_v7 }
 0x24f   :  { %648 = vmatprep.subr.bf16.mxu0 %v1797_v3  ;;  %689 = vmatprep.subr.bf16.mxu1 %v1817_v10 }
 0x250   :  { %678 = vmatprep.mubr.bf16.mxu0 %v1737_v0  ;;  %719 = vmatprep.mubr.bf16.mxu1 %v1737_v0 }
 0x252   :  { %649 = vmatpush1.bf16.msra.mxu0 %v1800_v4  ;;  %690 = vmatpush1.bf16.msra.mxu1 %v1819_v11 }
 0x253   :  { %650 = vmatprep.subr.bf16.mxu0 %v1803_v5  ;;  %691 = vmatprep.subr.bf16.mxu1 %v1827_v14 }
 0x256   :  { %651 = vmatpush1.bf16.msra.mxu0 %v1810_v8  ;;  %692 = vmatpush1.bf16.msra.mxu1 %v1831_v15 }
 0x257   :  { %652 = vmatprep.subr.bf16.mxu0 %v1814_v9  ;;  %693 = vmatprep.subr.bf16.mxu1 %v1834_v16 }
 0x25a   :  { %653 = vmatpush1.bf16.msra.mxu0 %v1823_v12  ;;  %694 = vmatpush1.bf16.msra.mxu1 %v1843_v19 }
 0x25b   :  { %654 = vmatprep.subr.bf16.mxu0 %v1825_v13  ;;  %695 = vmatprep.subr.bf16.mxu1 %v1846_v20 }
 0x25e   :  { %655 = vmatpush1.bf16.msra.mxu0 %v1837_v17  ;;  %696 = vmatpush1.bf16.msra.mxu1 %v1855_v23 }
 0x25f   :  { %656 = vmatprep.subr.bf16.mxu0 %v1840_v18  ;;  %697 = vmatprep.subr.bf16.mxu1 %v1858_v24 }
 0x262   :  { %657 = vmatpush1.bf16.msra.mxu0 %v1848_v21  ;;  %698 = vmatpush1.bf16.msra.mxu1 %v1867_v27 }
 0x263   :  { %658 = vmatprep.subr.bf16.mxu0 %v1851_v22  ;;  %699 = vmatprep.subr.bf16.mxu1 %v1870_v28 }
 0x266   :  { %659 = vmatpush1.bf16.msra.mxu0 %v1861_v25  ;;  %700 = vmatpush1.bf16.msra.mxu1 %v1877_v31 }
 0x267   :  { %660 = vmatprep.subr.bf16.mxu0 %v1864_v26  ;;  %701 = vmatprep.subr.bf16.mxu1 %v1880_v32 }
 0x26a   :  { %661 = vmatpush1.bf16.msra.mxu0 %v1873_v29  ;;  %702 = vmatpush1.bf16.msra.mxu1 %v1884_v34 }
 0x26b   :  { %768 = vmatprep.subr.bf16.mxu0 %v1792_v1  ;;  %809 = vmatprep.subr.bf16.mxu1 %v1805_v6 }
 0x30d   :  { %v558_v45 = vpop.f32.mrf.mxu0  ;;  %v599_v46 = vpop.f32.mrf.mxu1 }
 0x30e   :  { %v606_v48 = vadd.f32 %v558_v45, %v519_v35  ;;  %v608_v63 = vadd.f32 %v599_v46, %v521_v60 }
 0x30f   :  { %v560_v49 = vpop.f32.mrf.mxu0  ;;  %v601_v50 = vpop.f32.mrf.mxu1 }
 0x310   :  { %v1339_v51 = vmul.f32 -1.442695, %v606_v48  ;;  %v607_v52 = vadd.f32 %v560_v49, %v520_v47  ;;  %v609_v59 = vadd.f32 %v601_v50, %v522_v58 }
 0x311   :  { %v562_v53 = vpop.f32.mrf.mxu0  ;;  %v603_v54 = vpop.f32.mrf.mxu1 }
 0x312   :  { %1451 = vpow2.f32 %v1339_v51  ;;  %v1340_v55 = vmul.f32 -1.442695, %v607_v52  ;;  %v1341_v61 = vmul.f32 -1.442695, %v609_v59  ;;  %v642_v51 = vld [vmem:[#allocation4 + $0x68] sm:$0xff] }
 0x313   :  { %v563_v56 = vpop.f32.mrf.mxu0  ;;  %v604_v57 = vpop.f32.mrf.mxu1 }
 0x314   :  { %1453 = vpow2.f32 %v1340_v55 }
 0x315   :  { %1455 = vpow2.f32 %v1341_v61 }
 0x31f   :  { %v1452_v62 = vpop.eup %1451 }
 0x320   :  { %v613_v30 = vadd.f32 1.0, %v1452_v62  ;;  %v644_v62 = vld [vmem:[#allocation4 + $0x78] sm:$0xff] }
 0x321   :  { %v1454_v33 = vpop.eup %1453 }
 0x322   :  { %1457 = vrcp.f32 %v613_v30  ;;  %v619_v36 = vadd.f32 1.0, %v1454_v33  ;;  %v1456_v37 = vpop.eup %1455  ;;  %v643_v30 = vld [vmem:[#allocation4 + $0x70] sm:$0xff] }
 0x323   :  { %1459 = vtanh.f32 %v608_v63  ;;  %v626_v42 = vadd.f32 1.0, %v1456_v37 }
 0x324   :  { %1461 = vrcp.f32 %v619_v36 }
 0x325   :  { %1463 = vrcp.f32 %v626_v42 }
 0x32f   :  { %v1458_v38 = vpop.eup %1457 }
 0x330   :  { %v1460_v39 = vpop.eup %1459 }
 0x331   :  { %v1462_v41 = vpop.eup %1461  ;;  %v630_v43 = vmul.f32 %v1460_v39, %v1458_v38 }
 0x332   :  { %v629_v44 = vmul.f32 %v1462_v41, %v1962_v40  ;;  %v1464_v45 = vpop.eup %1463  ;;  %v641_v40 = vld [vmem:[#allocation4 + $0x60] sm:$0xff] }
 0x334   :  { %v2000_v35 = vadd.f32 %v630_v43, %v629_v44 }
 0x336   :  { %1465 = vtanh.f32 %v2000_v35 }
 0x343   :  { %v1466_v46 = vpop.eup %1465 }
 0x344   :  { %v633_v47 = vmul.f32 %v1466_v46, %v1464_v45 }
 0x346   :  { %637 = vst [vmem:[#allocation12 + $0x10] sm:$0xff] %v633_v47  ;;  %v645_v48 = vpack.c.bf16 %v633_v47, %v633_v47 }
 0x348   :  { %679 = vmatmul.mubr.bf16.vlgmr.msra.gmra.mxu0 %v645_v48  ;;  %720 = vmatmul.mubr.bf16.vlgmr.msra.gmra.mxu1 %v645_v48 }
 0x349   :  { %769 = vmatpush1.bf16.msra.mxu0 %v1794_v2  ;;  %810 = vmatpush1.bf16.msra.mxu1 %v1807_v7 }
 0x34a   :  { %770 = vmatprep.subr.bf16.mxu0 %v1797_v3  ;;  %811 = vmatprep.subr.bf16.mxu1 %v1817_v10 }
 0x34b   :  { %800 = vmatprep.mubr.bf16.mxu0 %v1737_v0  ;;  %841 = vmatprep.mubr.bf16.mxu1 %v1737_v0 }
 0x34d   :  { %771 = vmatpush1.bf16.msra.mxu0 %v1800_v4  ;;  %812 = vmatpush1.bf16.msra.mxu1 %v1819_v11 }
 0x34e   :  { %772 = vmatprep.subr.bf16.mxu0 %v1803_v5  ;;  %813 = vmatprep.subr.bf16.mxu1 %v1827_v14 }
 0x351   :  { %773 = vmatpush1.bf16.msra.mxu0 %v1810_v8  ;;  %814 = vmatpush1.bf16.msra.mxu1 %v1831_v15 }
 0x352   :  { %774 = vmatprep.subr.bf16.mxu0 %v1814_v9  ;;  %815 = vmatprep.subr.bf16.mxu1 %v1834_v16 }
 0x355   :  { %775 = vmatpush1.bf16.msra.mxu0 %v1823_v12  ;;  %816 = vmatpush1.bf16.msra.mxu1 %v1843_v19 }
 0x356   :  { %776 = vmatprep.subr.bf16.mxu0 %v1825_v13  ;;  %817 = vmatprep.subr.bf16.mxu1 %v1846_v20 }
 0x359   :  { %777 = vmatpush1.bf16.msra.mxu0 %v1837_v17  ;;  %818 = vmatpush1.bf16.msra.mxu1 %v1855_v23 }
 0x35a   :  { %778 = vmatprep.subr.bf16.mxu0 %v1840_v18  ;;  %819 = vmatprep.subr.bf16.mxu1 %v1858_v24 }
 0x35d   :  { %779 = vmatpush1.bf16.msra.mxu0 %v1848_v21  ;;  %820 = vmatpush1.bf16.msra.mxu1 %v1867_v27 }
 0x35e   :  { %780 = vmatprep.subr.bf16.mxu0 %v1851_v22  ;;  %821 = vmatprep.subr.bf16.mxu1 %v1870_v28 }
 0x361   :  { %781 = vmatpush1.bf16.msra.mxu0 %v1861_v25  ;;  %822 = vmatpush1.bf16.msra.mxu1 %v1877_v31 }
 0x362   :  { %782 = vmatprep.subr.bf16.mxu0 %v1864_v26  ;;  %823 = vmatprep.subr.bf16.mxu1 %v1880_v32 }
 0x365   :  { %783 = vmatpush1.bf16.msra.mxu0 %v1873_v29  ;;  %824 = vmatpush1.bf16.msra.mxu1 %v1884_v34 }
 0x366   :  { %890 = vmatprep.subr.bf16.mxu0 %v1792_v1  ;;  %931 = vmatprep.subr.bf16.mxu1 %v1805_v6 }
 0x408   :  { %v680_v49 = vpop.f32.mrf.mxu0  ;;  %v721_v50 = vpop.f32.mrf.mxu1 }
 0x409   :  { %v728_v52 = vadd.f32 %v680_v49, %v641_v40  ;;  %v730_v37 = vadd.f32 %v721_v50, %v643_v30 }
 0x40a   :  { %v682_v53 = vpop.f32.mrf.mxu0  ;;  %v723_v54 = vpop.f32.mrf.mxu1 }
 0x40b   :  { %v1342_v55 = vmul.f32 -1.442695, %v728_v52  ;;  %v729_v56 = vadd.f32 %v682_v53, %v642_v51  ;;  %v731_v63 = vadd.f32 %v723_v54, %v644_v62 }
 0x40c   :  { %v684_v57 = vpop.f32.mrf.mxu0  ;;  %v725_v58 = vpop.f32.mrf.mxu1 }
 0x40d   :  { %1467 = vpow2.f32 %v1342_v55  ;;  %v1343_v59 = vmul.f32 -1.442695, %v729_v56  ;;  %v1344_v33 = vmul.f32 -1.442695, %v731_v63  ;;  %v764_v55 = vld [vmem:[#allocation4 + $0x88] sm:$0xff] }
 0x40e   :  { %v685_v60 = vpop.f32.mrf.mxu0  ;;  %v726_v61 = vpop.f32.mrf.mxu1 }
 0x40f   :  { %1469 = vpow2.f32 %v1343_v59 }
 0x410   :  { %1471 = vpow2.f32 %v1344_v33 }
 0x41a   :  { %v1468_v36 = vpop.eup %1467 }
 0x41b   :  { %v735_v38 = vadd.f32 1.0, %v1468_v36  ;;  %v766_v36 = vld [vmem:[#allocation4 + $0x98] sm:$0xff] }
 0x41c   :  { %v1470_v39 = vpop.eup %1469 }
 0x41d   :  { %1473 = vrcp.f32 %v735_v38  ;;  %v741_v41 = vadd.f32 1.0, %v1470_v39  ;;  %v1472_v42 = vpop.eup %1471 }
 0x41e   :  { %1475 = vtanh.f32 %v730_v37  ;;  %v748_v46 = vadd.f32 1.0, %v1472_v42  ;;  %v765_v37 = vld [vmem:[#allocation4 + $0x90] sm:$0xff] }
 0x41f   :  { %1477 = vrcp.f32 %v741_v41 }
 0x420   :  { %1479 = vrcp.f32 %v748_v46 }
 0x42a   :  { %v1474_v43 = vpop.eup %1473 }
 0x42b   :  { %v1476_v44 = vpop.eup %1475 }
 0x42c   :  { %v1478_v45 = vpop.eup %1477  ;;  %v752_v47 = vmul.f32 %v1476_v44, %v1474_v43 }
 0x42d   :  { %v751_v48 = vmul.f32 %v1478_v45, %v2000_v35  ;;  %v1480_v49 = vpop.eup %1479  ;;  %v763_v35 = vld [vmem:[#allocation4 + $0x80] sm:$0xff] }
 0x42f   :  { %v2038_v40 = vadd.f32 %v752_v47, %v751_v48 }
 0x431   :  { %1481 = vtanh.f32 %v2038_v40 }
 0x43e   :  { %v1482_v50 = vpop.eup %1481 }
 0x43f   :  { %v755_v51 = vmul.f32 %v1482_v50, %v1480_v49 }
 0x441   :  { %759 = vst [vmem:[#allocation12 + $0x18] sm:$0xff] %v755_v51  ;;  %v767_v52 = vpack.c.bf16 %v755_v51, %v755_v51 }
 0x443   :  { %801 = vmatmul.mubr.bf16.vlgmr.msra.gmra.mxu0 %v767_v52  ;;  %842 = vmatmul.mubr.bf16.vlgmr.msra.gmra.mxu1 %v767_v52 }
 0x444   :  { %891 = vmatpush1.bf16.msra.mxu0 %v1794_v2  ;;  %932 = vmatpush1.bf16.msra.mxu1 %v1807_v7 }
 0x445   :  { %892 = vmatprep.subr.bf16.mxu0 %v1797_v3  ;;  %933 = vmatprep.subr.bf16.mxu1 %v1817_v10 }
 0x446   :  { %922 = vmatprep.mubr.bf16.mxu0 %v1737_v0  ;;  %963 = vmatprep.mubr.bf16.mxu1 %v1737_v0 }
 0x448   :  { %893 = vmatpush1.bf16.msra.mxu0 %v1800_v4  ;;  %934 = vmatpush1.bf16.msra.mxu1 %v1819_v11 }
 0x449   :  { %894 = vmatprep.subr.bf16.mxu0 %v1803_v5  ;;  %935 = vmatprep.subr.bf16.mxu1 %v1827_v14 }
 0x44c   :  { %895 = vmatpush1.bf16.msra.mxu0 %v1810_v8  ;;  %936 = vmatpush1.bf16.msra.mxu1 %v1831_v15 }
 0x44d   :  { %896 = vmatprep.subr.bf16.mxu0 %v1814_v9  ;;  %937 = vmatprep.subr.bf16.mxu1 %v1834_v16 }
 0x450   :  { %897 = vmatpush1.bf16.msra.mxu0 %v1823_v12  ;;  %938 = vmatpush1.bf16.msra.mxu1 %v1843_v19 }
 0x451   :  { %898 = vmatprep.subr.bf16.mxu0 %v1825_v13  ;;  %939 = vmatprep.subr.bf16.mxu1 %v1846_v20 }
 0x454   :  { %899 = vmatpush1.bf16.msra.mxu0 %v1837_v17  ;;  %940 = vmatpush1.bf16.msra.mxu1 %v1855_v23 }
 0x455   :  { %900 = vmatprep.subr.bf16.mxu0 %v1840_v18  ;;  %941 = vmatprep.subr.bf16.mxu1 %v1858_v24 }
 0x458   :  { %901 = vmatpush1.bf16.msra.mxu0 %v1848_v21  ;;  %942 = vmatpush1.bf16.msra.mxu1 %v1867_v27 }
 0x459   :  { %902 = vmatprep.subr.bf16.mxu0 %v1851_v22  ;;  %943 = vmatprep.subr.bf16.mxu1 %v1870_v28 }
 0x45c   :  { %903 = vmatpush1.bf16.msra.mxu0 %v1861_v25  ;;  %944 = vmatpush1.bf16.msra.mxu1 %v1877_v31 }
 0x45d   :  { %904 = vmatprep.subr.bf16.mxu0 %v1864_v26  ;;  %945 = vmatprep.subr.bf16.mxu1 %v1880_v32 }
 0x460   :  { %905 = vmatpush1.bf16.msra.mxu0 %v1873_v29  ;;  %946 = vmatpush1.bf16.msra.mxu1 %v1884_v34 }
 0x461   :  { %1012 = vmatprep.subr.bf16.mxu0 %v1792_v1  ;;  %1053 = vmatprep.subr.bf16.mxu1 %v1805_v6 }
 0x503   :  { %v802_v53 = vpop.f32.mrf.mxu0  ;;  %v843_v54 = vpop.f32.mrf.mxu1 }
 0x504   :  { %v850_v56 = vadd.f32 %v802_v53, %v763_v35  ;;  %v852_v39 = vadd.f32 %v843_v54, %v765_v37  ;;  %v1556_v37 = vld [vmem:[#allocation7 + $0xac] ss:$16 sps:$4 sm:$0xff]  }
 0x505   :  { %v804_v57 = vpop.f32.mrf.mxu0  ;;  %v845_v58 = vpop.f32.mrf.mxu1 }
 0x506   :  { %v1345_v59 = vmul.f32 -1.442695, %v850_v56  ;;  %v851_v60 = vadd.f32 %v804_v57, %v764_v55  ;;  %v853_v1 = vadd.f32 %v845_v58, %v766_v36  ;;  %v1554_v36 = vld [vmem:[#allocation7 + $0xc8] ss:$16 sps:$4 sm:$0xff]  }
 0x507   :  { %v806_v61 = vpop.f32.mrf.mxu0  ;;  %v847_v62 = vpop.f32.mrf.mxu1 }
 0x508   :  { %1483 = vpow2.f32 %v1345_v59  ;;  %v1346_v63 = vmul.f32 -1.442695, %v851_v60  ;;  %v1347_v6 = vmul.f32 -1.442695, %v853_v1  ;;  %v1549_v61 = vld [vmem:[#allocation7 + $0xe0] ss:$16 sps:$4 sm:$0xff]  }
 0x509   :  { %v807_v30 = vpop.f32.mrf.mxu0  ;;  %v848_v33 = vpop.f32.mrf.mxu1  ;;  %v1550_v62 = vld [vmem:[#allocation7 + $0xe8] ss:$16 sps:$4 sm:$0xff]   ;;  %v1555_v1 = vld [vmem:[#allocation7 + $0xa4] ss:$16 sps:$4 sm:$0xff]  }
 0x50a   :  { %1485 = vpow2.f32 %v1346_v63  ;;  %v1551_v63 = vld [vmem:[#allocation7 + $0xc4] ss:$16 sps:$4 sm:$0xff]   ;;  %v1552_v30 = vld [vmem:[#allocation7 + $0xcc] ss:$16 sps:$4 sm:$0xff]   ;;  %v1553_v33 = vld [vmem:[#allocation7 + $0xc0] ss:$16 sps:$4 sm:$0xff]  }
 0x50b   :  { %1487 = vpow2.f32 %v1347_v6  ;;  %v1557_v6 = vld [vmem:[#allocation7 + $0xa0] ss:$16 sps:$4 sm:$0xff]  }
 0x515   :  { %v1484_v38 = vpop.eup %1483 }
 0x516   :  { %v857_v41 = vadd.f32 1.0, %v1484_v38  ;;  %v1558_v38 = vld [vmem:[#allocation7 + $0xa8] ss:$16 sps:$4 sm:$0xff]  }
 0x517   :  { %v1486_v42 = vpop.eup %1485 }
 0x518   :  { %1489 = vrcp.f32 %v857_v41  ;;  %v863_v43 = vadd.f32 1.0, %v1486_v42  ;;  %v1488_v44 = vpop.eup %1487  ;;  %v1560_v41 = vld [vmem:[#allocation7 + $0x8c] ss:$16 sps:$4 sm:$0xff]   ;;  %v1561_v42 = vld [vmem:[#allocation7 + $0x80] ss:$16 sps:$4 sm:$0xff]  }
 0x519   :  { %1491 = vtanh.f32 %v852_v39  ;;  %v870_v48 = vadd.f32 1.0, %v1488_v44  ;;  %v1559_v39 = vld [vmem:[#allocation7 + $0x84] ss:$16 sps:$4 sm:$0xff]   ;;  %v1564_v44 = vld [vmem:[#allocation7 + $0x6c] ss:$16 sps:$4 sm:$0xff]  }
 0x51a   :  { %1493 = vrcp.f32 %v863_v43  ;;  %v1562_v43 = vld [vmem:[#allocation7 + $0x88] ss:$16 sps:$4 sm:$0xff]  }
 0x51b   :  { %1495 = vrcp.f32 %v870_v48  ;;  %v1568_v48 = vld [vmem:[#allocation7 + $0x4c] ss:$16 sps:$4 sm:$0xff]  }
 0x525   :  { %v1490_v45 = vpop.eup %1489 }
 0x526   :  { %v1492_v46 = vpop.eup %1491 }
 0x527   :  { %v1494_v47 = vpop.eup %1493  ;;  %v874_v49 = vmul.f32 %v1492_v46, %v1490_v45  ;;  %v1565_v45 = vld [vmem:[#allocation7 + $0x60] ss:$16 sps:$4 sm:$0xff]   ;;  %v1566_v46 = vld [vmem:[#allocation7 + $0x68] ss:$16 sps:$4 sm:$0xff]  }
 0x528   :  { %v873_v50 = vmul.f32 %v1494_v47, %v2038_v40  ;;  %v1496_v52 = vpop.eup %1495  ;;  %v1567_v47 = vld [vmem:[#allocation7 + $0x44] ss:$16 sps:$4 sm:$0xff]  }
 0x52a   :  { %v2076_v51 = vadd.f32 %v874_v49, %v873_v50  ;;  %v1569_v49 = vld [vmem:[#allocation7 + $0x40] ss:$16 sps:$4 sm:$0xff]   ;;  %v1570_v50 = vld [vmem:[#allocation7 + $0x48] ss:$16 sps:$4 sm:$0xff]  }
 0x52c   :  { %1497 = vtanh.f32 %v2076_v51 }
 0x539   :  { %v1498_v35 = vpop.eup %1497 }
 0x53a   :  { %v877_v53 = vmul.f32 %v1498_v35, %v1496_v52  ;;  %v1572_v52 = vld [vmem:[#allocation7 + $0x2c] ss:$16 sps:$4 sm:$0xff]   ;;  %v1573_v35 = vld [vmem:[#allocation7 + $0x20] ss:$16 sps:$4 sm:$0xff]  }
 0x53c   :  { %881 = vst [vmem:[#allocation12 + $0x20] sm:$0xff] %v877_v53  ;;  %v889_v54 = vpack.c.bf16 %v877_v53, %v877_v53  ;;  %v1574_v53 = vld [vmem:[#allocation7 + $0x28] ss:$16 sps:$4 sm:$0xff]  }
 0x53e   :  { %923 = vmatmul.mubr.bf16.vlgmr.msra.gmra.mxu0 %v889_v54  ;;  %964 = vmatmul.mubr.bf16.vlgmr.msra.gmra.mxu1 %v889_v54  ;;  %v1575_v54 = vld [vmem:[#allocation7 + $0x4] ss:$16 sps:$4 sm:$0xff]  }
 0x53f   :  { %1013 = vmatpush1.bf16.msra.mxu0 %v1794_v2  ;;  %1054 = vmatpush1.bf16.msra.mxu1 %v1807_v7  ;;  %v1547_v2 = vld [vmem:[#allocation7 + $0xe4] ss:$16 sps:$4 sm:$0xff]  }
 0x540   :  { %1014 = vmatprep.subr.bf16.mxu0 %v1797_v3  ;;  %1055 = vmatprep.subr.bf16.mxu1 %v1817_v10  ;;  %v1548_v3 = vld [vmem:[#allocation7 + $0xec] ss:$16 sps:$4 sm:$0xff]  }
 0x541   :  { %1044 = vmatprep.mubr.bf16.mxu0 %v1737_v0  ;;  %1085 = vmatprep.mubr.bf16.mxu1 %v1737_v0 }
 0x543   :  { %1015 = vmatpush1.bf16.msra.mxu0 %v1800_v4  ;;  %1056 = vmatpush1.bf16.msra.mxu1 %v1819_v11  ;;  %v885_v4 = vld [vmem:[#allocation4 + $0xa0] sm:$0xff] }
 0x544   :  { %1016 = vmatprep.subr.bf16.mxu0 %v1803_v5  ;;  %1057 = vmatprep.subr.bf16.mxu1 %v1827_v14 }
 0x547   :  { %1017 = vmatpush1.bf16.msra.mxu0 %v1810_v8  ;;  %1058 = vmatpush1.bf16.msra.mxu1 %v1831_v15  ;;  %v886_v8 = vld [vmem:[#allocation4 + $0xa8] sm:$0xff] }
 0x548   :  { %1018 = vmatprep.subr.bf16.mxu0 %v1814_v9  ;;  %1059 = vmatprep.subr.bf16.mxu1 %v1834_v16 }
 0x54b   :  { %1019 = vmatpush1.bf16.msra.mxu0 %v1823_v12  ;;  %1060 = vmatpush1.bf16.msra.mxu1 %v1843_v19  ;;  %v888_v19 = vld [vmem:[#allocation4 + $0xb8] sm:$0xff] }
 0x54c   :  { %1020 = vmatprep.subr.bf16.mxu0 %v1825_v13  ;;  %1061 = vmatprep.subr.bf16.mxu1 %v1846_v20 }
 0x54f   :  { %1021 = vmatpush1.bf16.msra.mxu0 %v1837_v17  ;;  %1062 = vmatpush1.bf16.msra.mxu1 %v1855_v23 }
 0x550   :  { %1022 = vmatprep.subr.bf16.mxu0 %v1840_v18  ;;  %1063 = vmatprep.subr.bf16.mxu1 %v1858_v24 }
 0x553   :  { %1023 = vmatpush1.bf16.msra.mxu0 %v1848_v21  ;;  %1064 = vmatpush1.bf16.msra.mxu1 %v1867_v27  ;;  %v887_v21 = vld [vmem:[#allocation4 + $0xb0] sm:$0xff] }
 0x554   :  { %1024 = vmatprep.subr.bf16.mxu0 %v1851_v22  ;;  %1065 = vmatprep.subr.bf16.mxu1 %v1870_v28 }
 0x557   :  { %1025 = vmatpush1.bf16.msra.mxu0 %v1861_v25  ;;  %1066 = vmatpush1.bf16.msra.mxu1 %v1877_v31 }
 0x558   :  { %1026 = vmatprep.subr.bf16.mxu0 %v1864_v26  ;;  %1067 = vmatprep.subr.bf16.mxu1 %v1880_v32 }
 0x55b   :  { %1027 = vmatpush1.bf16.msra.mxu0 %v1873_v29  ;;  %1068 = vmatpush1.bf16.msra.mxu1 %v1884_v34 }
 0x55c   :  { %1134 = vmatprep.subr.bf16.mxu0 %v1547_v2  ;;  %1175 = vmatprep.subr.bf16.mxu1 %v1548_v3  ;;  %v1576_v2 = vld [vmem:[#allocation7 + $0xc] ss:$16 sps:$4 sm:$0xff]   ;;  %v1577_v3 = vld [vmem:[#allocation7] ss:$16 sps:$4 sm:$0xff]  }
 0x5fe   :  { %v924_v5 = vpop.f32.mrf.mxu0  ;;  %v965_v7 = vpop.f32.mrf.mxu1 }
 0x5ff   :  { %v972_v9 = vadd.f32 %v924_v5, %v885_v4  ;;  %v974_v24 = vadd.f32 %v965_v7, %v887_v21  ;;  %v1578_v4 = vld [vmem:[#allocation7 + $0x8] ss:$16 sps:$4 sm:$0xff]   ;;  %v1007_v5 = vld [vmem:[#allocation4 + $0xc0] sm:$0xff] }
 0x600   :  { %v926_v10 = vpop.f32.mrf.mxu0  ;;  %v967_v11 = vpop.f32.mrf.mxu1 }
 0x601   :  { %v1348_v12 = vmul.f32 -1.442695, %v972_v9  ;;  %v973_v13 = vadd.f32 %v926_v10, %v886_v8  ;;  %v975_v20 = vadd.f32 %v967_v11, %v888_v19  ;;  %v1008_v9 = vld [vmem:[#allocation4 + $0xc8] sm:$0xff] }
 0x602   :  { %v928_v14 = vpop.f32.mrf.mxu0  ;;  %v969_v15 = vpop.f32.mrf.mxu1 }
 0x603   :  { %1499 = vpow2.f32 %v1348_v12  ;;  %v1349_v16 = vmul.f32 -1.442695, %v973_v13  ;;  %v1350_v22 = vmul.f32 -1.442695, %v975_v20  ;;  %v1010_v20 = vld [vmem:[#allocation4 + $0xd8] sm:$0xff] }
 0x604   :  { %v929_v17 = vpop.f32.mrf.mxu0  ;;  %v970_v18 = vpop.f32.mrf.mxu1 }
 0x605   :  { %1501 = vpow2.f32 %v1349_v16 }
 0x606   :  { %1503 = vpow2.f32 %v1350_v22  ;;  %v1009_v22 = vld [vmem:[#allocation4 + $0xd0] sm:$0xff] }
 0x610   :  { %v1500_v23 = vpop.eup %1499 }
 0x611   :  { %v979_v25 = vadd.f32 1.0, %v1500_v23 }
 0x612   :  { %v1502_v26 = vpop.eup %1501 }
 0x613   :  { %1505 = vrcp.f32 %v979_v25  ;;  %v985_v27 = vadd.f32 1.0, %v1502_v26  ;;  %v1504_v28 = vpop.eup %1503 }
 0x614   :  { %1507 = vtanh.f32 %v974_v24  ;;  %v992_v34 = vadd.f32 1.0, %v1504_v28 }
 0x615   :  { %1509 = vrcp.f32 %v985_v27 }
 0x616   :  { %1511 = vrcp.f32 %v992_v34 }
 0x620   :  { %v1506_v29 = vpop.eup %1505 }
 0x621   :  { %v1508_v31 = vpop.eup %1507 }
 0x622   :  { %v1510_v32 = vpop.eup %1509  ;;  %v996_v40 = vmul.f32 %v1508_v31, %v1506_v29 }
 0x623   :  { %v995_v55 = vmul.f32 %v1510_v32, %v2076_v51  ;;  %v1512_v57 = vpop.eup %1511  ;;  %v1571_v51 = vld [vmem:[#allocation7 + $0x24] ss:$16 sps:$4 sm:$0xff]  }
 0x625   :  { %v2112_v56 = vadd.f32 %v996_v40, %v995_v55 }
 0x627   :  { %1513 = vtanh.f32 %v2112_v56 }
 0x634   :  { %v1514_v58 = vpop.eup %1513 }
 0x635   :  { %v999_v59 = vmul.f32 %v1514_v58, %v1512_v57 }
 0x637   :  { %1003 = vst [vmem:[#allocation12 + $0x28] sm:$0xff] %v999_v59  ;;  %v1011_v60 = vpack.c.bf16 %v999_v59, %v999_v59 }
 0x639   :  { %1045 = vmatmul.mubr.bf16.vlgmr.msra.gmra.mxu0 %v1011_v60  ;;  %1086 = vmatmul.mubr.bf16.vlgmr.msra.gmra.mxu1 %v1011_v60 }
 0x63a   :  { %1135 = vmatpush1.bf16.msra.mxu0 %v1549_v61  ;;  %1176 = vmatpush1.bf16.msra.mxu1 %v1550_v62 }
 0x63b   :  { %1136 = vmatprep.subr.bf16.mxu0 %v1551_v63  ;;  %1177 = vmatprep.subr.bf16.mxu1 %v1552_v30  ;;  %v1129_v63 = vld [vmem:[#allocation4 + $0xe0] sm:$0xff] }
 0x63c   :  { %1166 = vmatprep.mubr.bf16.mxu0 %v1737_v0  ;;  %1207 = vmatprep.mubr.bf16.mxu1 %v1737_v0  ;;  %v1563_v0 = vld [vmem:[#allocation7 + $0x64] ss:$16 sps:$4 sm:$0xff]  }
 0x63e   :  { %1137 = vmatpush1.bf16.msra.mxu0 %v1553_v33  ;;  %1178 = vmatpush1.bf16.msra.mxu1 %v1554_v36  ;;  %v1130_v36 = vld [vmem:[#allocation4 + $0xe8] sm:$0xff] }
 0x63f   :  { %1138 = vmatprep.subr.bf16.mxu0 %v1555_v1  ;;  %1179 = vmatprep.subr.bf16.mxu1 %v1556_v37 }
 0x642   :  { %1139 = vmatpush1.bf16.msra.mxu0 %v1557_v6  ;;  %1180 = vmatpush1.bf16.msra.mxu1 %v1558_v38 }
 0x643   :  { %1140 = vmatprep.subr.bf16.mxu0 %v1559_v39  ;;  %1181 = vmatprep.subr.bf16.mxu1 %v1560_v41 }
 0x646   :  { %1141 = vmatpush1.bf16.msra.mxu0 %v1561_v42  ;;  %1182 = vmatpush1.bf16.msra.mxu1 %v1562_v43 }
 0x647   :  { %1142 = vmatprep.subr.bf16.mxu0 %v1563_v0  ;;  %1183 = vmatprep.subr.bf16.mxu1 %v1564_v44  ;;  %v1132_v44 = vld [vmem:[#allocation4 + $0xf8] sm:$0xff] }
 0x64a   :  { %1143 = vmatpush1.bf16.msra.mxu0 %v1565_v45  ;;  %1184 = vmatpush1.bf16.msra.mxu1 %v1566_v46  ;;  %v1131_v46 = vld [vmem:[#allocation4 + $0xf0] sm:$0xff] }
 0x64b   :  { %1144 = vmatprep.subr.bf16.mxu0 %v1567_v47  ;;  %1185 = vmatprep.subr.bf16.mxu1 %v1568_v48 }
 0x64e   :  { %1145 = vmatpush1.bf16.msra.mxu0 %v1569_v49  ;;  %1186 = vmatpush1.bf16.msra.mxu1 %v1570_v50 }
 0x64f   :  { %1146 = vmatprep.subr.bf16.mxu0 %v1571_v51  ;;  %1187 = vmatprep.subr.bf16.mxu1 %v1572_v52 }
 0x652   :  { %1147 = vmatpush1.bf16.msra.mxu0 %v1573_v35  ;;  %1188 = vmatpush1.bf16.msra.mxu1 %v1574_v53 }
 0x653   :  { %1148 = vmatprep.subr.bf16.mxu0 %v1575_v54  ;;  %1189 = vmatprep.subr.bf16.mxu1 %v1576_v2 }
 0x656   :  { %1149 = vmatpush1.bf16.msra.mxu0 %v1577_v3  ;;  %1190 = vmatpush1.bf16.msra.mxu1 %v1578_v4 }
 0x6f9   :  { %v1046_v7 = vpop.f32.mrf.mxu0  ;;  %v1087_v8 = vpop.f32.mrf.mxu1 }
 0x6fa   :  { %v1094_v10 = vadd.f32 %v1046_v7, %v1007_v5  ;;  %v1096_v25 = vadd.f32 %v1087_v8, %v1009_v22 }
 0x6fb   :  { %v1048_v11 = vpop.f32.mrf.mxu0  ;;  %v1089_v12 = vpop.f32.mrf.mxu1 }
 0x6fc   :  { %v1351_v13 = vmul.f32 -1.442695, %v1094_v10  ;;  %v1095_v14 = vadd.f32 %v1048_v11, %v1008_v9  ;;  %v1097_v21 = vadd.f32 %v1089_v12, %v1010_v20 }
 0x6fd   :  { %v1050_v15 = vpop.f32.mrf.mxu0  ;;  %v1091_v16 = vpop.f32.mrf.mxu1 }
 0x6fe   :  { %1515 = vpow2.f32 %v1351_v13  ;;  %v1352_v17 = vmul.f32 -1.442695, %v1095_v14  ;;  %v1353_v23 = vmul.f32 -1.442695, %v1097_v21 }
 0x6ff   :  { %v1051_v18 = vpop.f32.mrf.mxu0  ;;  %v1092_v19 = vpop.f32.mrf.mxu1 }
 0x700   :  { %1517 = vpow2.f32 %v1352_v17 }
 0x701   :  { %1519 = vpow2.f32 %v1353_v23 }
 0x70b   :  { %v1516_v24 = vpop.eup %1515 }
 0x70c   :  { %v1101_v26 = vadd.f32 1.0, %v1516_v24 }
 0x70d   :  { %v1518_v27 = vpop.eup %1517 }
 0x70e   :  { %1521 = vrcp.f32 %v1101_v26  ;;  %v1107_v28 = vadd.f32 1.0, %v1518_v27  ;;  %v1520_v29 = vpop.eup %1519 }
 0x70f   :  { %1523 = vtanh.f32 %v1096_v25  ;;  %v1114_v40 = vadd.f32 1.0, %v1520_v29 }
 0x710   :  { %1525 = vrcp.f32 %v1107_v28 }
 0x711   :  { %1527 = vrcp.f32 %v1114_v40 }
 0x71b   :  { %v1522_v31 = vpop.eup %1521 }
 0x71c   :  { %v1524_v32 = vpop.eup %1523 }
 0x71d   :  { %v1526_v34 = vpop.eup %1525  ;;  %v1118_v55 = vmul.f32 %v1524_v32, %v1522_v31 }
 0x71e   :  { %v1117_v57 = vmul.f32 %v1526_v34, %v2112_v56  ;;  %v1528_v59 = vpop.eup %1527 }
 0x720   :  { %v1119_v58 = vadd.f32 %v1118_v55, %v1117_v57 }
 0x722   :  { %1529 = vtanh.f32 %v1119_v58 }
 0x72f   :  { %v1530_v60 = vpop.eup %1529 }
 0x730   :  { %v1121_v61 = vmul.f32 %v1530_v60, %v1528_v59 }
 0x732   :  { %1125 = vst [vmem:[#allocation12 + $0x30] sm:$0xff] %v1121_v61  ;;  %v1133_v62 = vpack.c.bf16 %v1121_v61, %v1121_v61 }
 0x734   :  { %1167 = vmatmul.mubr.bf16.vlgmr.msra.gmra.mxu0 %v1133_v62  ;;  %1208 = vmatmul.mubr.bf16.vlgmr.msra.gmra.mxu1 %v1133_v62 }
 0x7f4   :  { %v1168_v30 = vpop.f32.mrf.mxu0  ;;  %v1209_v33 = vpop.f32.mrf.mxu1 }
 0x7f5   :  { %v1216_v1 = vadd.f32 %v1168_v30, %v1129_v63  ;;  %v1218_v49 = vadd.f32 %v1209_v33, %v1131_v46 }
 0x7f6   :  { %v1170_v37 = vpop.f32.mrf.mxu0  ;;  %v1211_v6 = vpop.f32.mrf.mxu1 }
 0x7f7   :  { %v1354_v38 = vmul.f32 -1.442695, %v1216_v1  ;;  %v1217_v39 = vadd.f32 %v1170_v37, %v1130_v36  ;;  %v1219_v45 = vadd.f32 %v1211_v6, %v1132_v44 }
 0x7f8   :  { %v1172_v56 = vpop.f32.mrf.mxu0  ;;  %v1213_v41 = vpop.f32.mrf.mxu1 }
 0x7f9   :  { %1531 = vpow2.f32 %v1354_v38  ;;  %v1355_v42 = vmul.f32 -1.442695, %v1217_v39  ;;  %v1356_v47 = vmul.f32 -1.442695, %v1219_v45 }
 0x7fa   :  { %v1173_v43 = vpop.f32.mrf.mxu0  ;;  %v1214_v0 = vpop.f32.mrf.mxu1 }
 0x7fb   :  { %1533 = vpow2.f32 %v1355_v42 }
 0x7fc   :  { %1535 = vpow2.f32 %v1356_v47 }
 0x806   :  { %v1532_v48 = vpop.eup %1531 }
 0x807   :  { %v1223_v50 = vadd.f32 1.0, %v1532_v48 }
 0x808   :  { %v1534_v51 = vpop.eup %1533 }
 0x809   :  { %1537 = vrcp.f32 %v1223_v50  ;;  %v1229_v52 = vadd.f32 1.0, %v1534_v51  ;;  %v1536_v35 = vpop.eup %1535 }
 0x80a   :  { %1539 = vtanh.f32 %v1218_v49  ;;  %v1236_v3 = vadd.f32 1.0, %v1536_v35 }
 0x80b   :  { %1541 = vrcp.f32 %v1229_v52 }
 0x80c   :  { %1543 = vrcp.f32 %v1236_v3 }
 0x816   :  { %v1538_v53 = vpop.eup %1537 }
 0x817   :  { %v1540_v54 = vpop.eup %1539 }
 0x818   :  { %v1542_v2 = vpop.eup %1541  ;;  %v1240_v4 = vmul.f32 %v1540_v54, %v1538_v53 }
 0x819   :  { %v1239_v5 = vmul.f32 %v1542_v2, %v1119_v58  ;;  %v1544_v8 = vpop.eup %1543 }
 0x81b   :  { %v1241_v7 = vadd.f32 %v1240_v4, %v1239_v5 }
 0x81d   :  { %1545 = vtanh.f32 %v1241_v7  ;;  %1254 = vst [vmem:[#allocation15] sm:$0xff] %v1241_v7 }
 0x82a   :  { %v1546_v9 = vpop.eup %1545 }
 0x82b   :  { %v1243_v10 = vmul.f32 %v1546_v9, %v1544_v8 }
 0x82d   :  { %1247 = vst [vmem:[#allocation12 + $0x38] sm:$0xff] %v1243_v10  ;;  %1252 = vst [vmem:[#allocation13] sm:$0xff] %v1243_v10 }
 0x82e   :  { %1670 = shalt.err (!%p1667_p10)
}
 0x82f   :  { %1276 = dma.vmem_to_hbm [thread:$0]  %s1274_s3, 128, %s2132_s5, [#allocation14]  }
 0x830   :  { %s1679_s26 = scalar_lea.vmem %s1261_s20, 1024  ;;  %p1684_p12 = scmp.lt.s32.totalorder %s1261_s20, %s1261_s20 }
 0x831   :  { %p1680_p11 = scmp.ne.s32.totalorder %s1261_s20, %s1679_s26  ;;  %p1685_p13 = scmp.lt.s32.totalorder %s1679_s26, %s1679_s26 }
 0x833   :  { %p1686_p0 = por %p1685_p13, %p1684_p12 }
 0x835   :  { %p1687_p1 = pnand %p1686_p0, %p1680_p11 }
 0x837   :  { %1690 = shalt.err (!%p1687_p1)
}
 0x838   :  { %s1741_s27 = smov 128   ;;  %s1742_s28 = smov 8  }
 0x839   :  { %1266 = dma.vmem_to_hbm [thread:$0]  %s1261_s20, 1024, %s2131_s4, [#allocation6], %s1741_s27, %s1741_s27, %s1742_s28  }
 0x83a   :  { %s1699_s7 = scalar_lea.vmem %s1284_s22, 128  ;;  %p1704_p3 = scmp.lt.s32.totalorder %s1284_s22, %s1284_s22 }
 0x83b   :  { %p1700_p2 = scmp.ne.s32.totalorder %s1284_s22, %s1699_s7  ;;  %p1705_p4 = scmp.lt.s32.totalorder %s1699_s7, %s1699_s7 }
 0x83d   :  { %p1706_p5 = por %p1705_p4, %p1704_p3 }
 0x83f   :  { %p1707_p6 = pnand %p1706_p5, %p1700_p2 }
 0x841   :  { %1710 = shalt.err (!%p1707_p6)
}
 0x842   :  { %1286 = dma.vmem_to_hbm [thread:$0]  %s1284_s22, 128, %s2133_s6, [#allocation14]  }
 0x843   :  { %1725 = dma.done.wait [#allocation6], 1024  }
 0x844   :  { %1726 = vsyncadd [#allocation6], 4294966272 }
 0x845   :  { %1727 = dma.done.wait [#allocation14], 256  }
 0x846   :  { %1728 = vsyncadd [#allocation14], 4294967040 }
 0x847   :  { %1296 = vsyncpa [#allocation5], 1 }
 0x848   :  { %1297 = vsyncpa [#allocation8], 1 }
 0x849   :  { %1298 = vsyncpa [#allocation11], 1 }
 0x84a   :  { %1299 = vsyncpa [#allocation6], 1 }
 0x84b   :  { %1300 = vsyncpa [#allocation14], 1 }

</bundles_post_ra>
